<compile_context>
chip_gen: v7x
topology: tpu7x:2x2x1
jax: 0.10.0
libtpu: 0.0.40
codegen_flags: <defaults>
</compile_context>

<pallas_src>
import functools

import jax
import jax.numpy as jnp
from jax.experimental import pallas as pl
from jax.experimental.pallas import tpu as pltpu

N_PAD = 128  # lane-dense output / channel padding


# ------------------------------ tiling helper -------------------------------

def _pick_tile_m(M, max_tile):
    """Pick tile_m: multiple of 8, >= 2 grid steps when M >= 16, preferring an
    exact divisor of M (avoids masked partial tail blocks)."""
    if M <= 8:
        return M                      # block dim == full dim is always legal
    cap = max(8, (min(max_tile, M // 2) // 8) * 8)
    for d in range(cap, 7, -8):       # largest multiple-of-8 divisor <= cap
        if M % d == 0:
            return d
        if cap - d >= 512:            # bounded search
            break
    return cap                        # masked tail block (correct, slightly slower)


# ----------------------------- Pallas kernels ------------------------------

def _matmul_bias_act_kernel(x_ref, w_ref, b_ref, o_ref, *, apply_relu):
    # Fused (TM,K)bf16 @ (K,128)bf16 -> f32 accum + bias + optional ReLU.
    y = jnp.dot(x_ref[...], w_ref[...], preferred_element_type=jnp.float32)
    y = y + b_ref[...]
    if apply_relu:
        y = jnp.maximum(y, 0.0)
    o_ref[...] = y.astype(o_ref.dtype)


def matmul_bias_act(x, w, b2d, *, apply_relu, out_dtype=jnp.bfloat16, max_tile_m=1024):
    """x: (M, K) bf16, w: (K, N) bf16, b2d: (1, N) f32 -> (M, N) out_dtype.

    Tiled & software-pipelined over M; weight/bias stay VMEM-resident."""
    M, K = x.shape
    K2, N = w.shape
    assert K == K2 and b2d.shape == (1, N)
    tm = _pick_tile_m(M, max_tile_m)
    grid = (pl.cdiv(M, tm),)
    return pl.pallas_call(
        functools.partial(_matmul_bias_act_kernel, apply_relu=apply_relu),
        out_shape=jax.ShapeDtypeStruct((M, N), out_dtype),
        grid_spec=pltpu.PrefetchScalarGridSpec(
            num_scalar_prefetch=0,
            grid=grid,
            in_specs=[
                pl.BlockSpec((tm, K), lambda i: (i, 0)),  # activations, tiled over M
                pl.BlockSpec((K, N), lambda i: (0, 0)),   # weight: VMEM-resident
                pl.BlockSpec((1, N), lambda i: (0, 0)),   # bias row (lane-dense)
            ],
            out_specs=pl.BlockSpec((tm, N), lambda i: (i, 0)),
        ),
        compiler_params=pltpu.CompilerParams(dimension_semantics=("parallel",)),
    )(x, w, b2d)


def _fc_fused_kernel(x_ref, w1_ref, b1_ref, w2_ref, b2_ref, w3_ref, b3_ref, o_ref):
    # fc1+ReLU -> fc2+ReLU -> fc3 chained in one kernel; all weights in VMEM.
    # bf16 MXU inputs, f32 accumulation/bias.
    h = jnp.dot(x_ref[...], w1_ref[...], preferred_element_type=jnp.float32)
    h = jnp.maximum(h + b1_ref[...], 0.0)
    h = jnp.dot(h.astype(w2_ref.dtype), w2_ref[...], preferred_element_type=jnp.float32)
    h = jnp.maximum(h + b2_ref[...], 0.0)
    h = jnp.dot(h.astype(w3_ref.dtype), w3_ref[...], preferred_element_type=jnp.float32)
    o_ref[...] = (h + b3_ref[...]).astype(o_ref.dtype)


def fc_fused(x, pp, *, max_tile_m=512):
    """x: (B, 400) bf16 -> (B, 128) f32 padded logits (first 10 columns valid)."""
    M, K = x.shape
    tm = _pick_tile_m(M, max_tile_m)
    grid = (pl.cdiv(M, tm),)
    const = lambda i: (0, 0)
    return pl.pallas_call(
        _fc_fused_kernel,
        out_shape=jax.ShapeDtypeStruct((M, N_PAD), jnp.float32),
        grid_spec=pltpu.PrefetchScalarGridSpec(
            num_scalar_prefetch=0,
            grid=grid,
            in_specs=[
                pl.BlockSpec((tm, K), lambda i: (i, 0)),
                pl.BlockSpec((K, N_PAD), const), pl.BlockSpec((1, N_PAD), const),
                pl.BlockSpec((N_PAD, N_PAD), const), pl.BlockSpec((1, N_PAD), const),
                pl.BlockSpec((N_PAD, N_PAD), const), pl.BlockSpec((1, N_PAD), const),
            ],
            out_specs=pl.BlockSpec((tm, N_PAD), lambda i: (i, 0)),
        ),
        compiler_params=pltpu.CompilerParams(dimension_semantics=("parallel",)),
    )(x, pp["f1_w"], pp["f1_b"], pp["f2_w"], pp["f2_b"], pp["f3_w"], pp["f3_b"])


# ----------------------------- XLA layout glue ------------------------------

def _im2col_nhwc(x, kh, kw):
    """x: (B, H, W, C) NHWC -> patches (B*OH*OW, kh*kw*C), feature order (kh, kw, c).
    No K padding (the contraction dim is passed whole to the kernel BlockSpec)."""
    B, H, W, C = x.shape
    OH, OW = H - kh + 1, W - kw + 1
    taps = [x[:, i:i + OH, j:j + OW, :] for i in range(kh) for j in range(kw)]
    p = jnp.concatenate(taps, axis=-1)            # (B, OH, OW, kh*kw*C)
    return p.reshape(B * OH * OW, kh * kw * C), (B, OH, OW)


def maxpool2x2_nhwc(x):
    """x: (B, H, W, C) -> (B, H//2, W//2, C); trivial VPU max done in XLA."""
    a = jnp.maximum(x[:, 0::2, 0::2, :], x[:, 0::2, 1::2, :])
    b = jnp.maximum(x[:, 1::2, 0::2, :], x[:, 1::2, 1::2, :])
    return jnp.maximum(a, b)


# --------------------------- parameter preparation ---------------------------

def init_params(key):
    """PyTorch-default-style uniform(-1/sqrt(fan_in), 1/sqrt(fan_in)); torch layouts."""
    def u(k, shape, fan_in):
        bound = 1.0 / (fan_in ** 0.5)
        return jax.random.uniform(k, shape, jnp.float32, -bound, bound)

    ks = jax.random.split(key, 10)
    return {
        "conv1_w": u(ks[0], (6, 3, 5, 5), 3 * 5 * 5),
        "conv1_b": u(ks[1], (6,), 3 * 5 * 5),
        "conv2_w": u(ks[2], (16, 6, 5, 5), 6 * 5 * 5),
        "conv2_b": u(ks[3], (16,), 6 * 5 * 5),
        "fc1_w":  u(ks[4], (16 * 5 * 5, 120), 16 * 5 * 5),
        "fc1_b":  u(ks[5], (120,), 16 * 5 * 5),
        "fc2_w":  u(ks[6], (120, 84), 120),
        "fc2_b":  u(ks[7], (84,), 120),
        "fc3_w":  u(ks[8], (84, 10), 84),
        "fc3_b":  u(ks[9], (10,), 84),
    }


def prepare_params(params):
    """One-time transform to bf16, lane-dense (N->128), NHWC-ordered operands.
    Contraction dims (75 / 150 / 400) are NOT padded; only fc2/fc3 row dims are
    padded to 128 so the fused FC chain stays lane/sublane aligned."""
    bf16 = jnp.bfloat16

    def pad_cols(m, cols):
        return jnp.pad(m, ((0, 0), (0, cols - m.shape[1]))).astype(bf16)

    def pad_rows_cols(m, rows, cols):
        r, c = m.shape
        return jnp.pad(m, ((0, rows - r), (0, cols - c))).astype(bf16)

    def pad_bias(b, n):
        return jnp.pad(b, (0, n - b.shape[0])).reshape(1, n).astype(jnp.float32)

    # conv weight (CO, CI, KH, KW) -> (KH*KW*CI, CO) matching im2col tap order.
    w1 = params["conv1_w"].transpose(2, 3, 1, 0).reshape(5 * 5 * 3, 6)
    w2 = params["conv2_w"].transpose(2, 3, 1, 0).reshape(5 * 5 * 6, 16)
    # fc1 rows reordered from torch NCHW flatten (c,h,w) to NHWC flatten (h,w,c).
    fc1 = params["fc1_w"].reshape(16, 5, 5, 120).transpose(1, 2, 0, 3).reshape(400, 120)
    return {
        "c1_w": pad_cols(w1, N_PAD),  "c1_b": pad_bias(params["conv1_b"], N_PAD),
        "c2_w": pad_cols(w2, N_PAD),  "c2_b": pad_bias(params["conv2_b"], N_PAD),
        "f1_w": pad_cols(fc1, N_PAD), "f1_b": pad_bias(params["fc1_b"], N_PAD),
        "f2_w": pad_rows_cols(params["fc2_w"], N_PAD, N_PAD),
        "f2_b": pad_bias(params["fc2_b"], N_PAD),
        "f3_w": pad_rows_cols(params["fc3_w"], N_PAD, N_PAD),
        "f3_b": pad_bias(params["fc3_b"], N_PAD),
    }


# ------------------------------- the network --------------------------------

@jax.jit
def net_forward(prepared, x_nchw):
    x = x_nchw.transpose(0, 2, 3, 1).astype(jnp.bfloat16)        # NHWC bf16, once

    # x = pool(relu(conv1(x)))
    p, (B, OH, OW) = _im2col_nhwc(x, 5, 5)                        # (B*28*28, 75) bf16
    y = matmul_bias_act(p, prepared["c1_w"], prepared["c1_b"], apply_relu=True)
    x = maxpool2x2_nhwc(y[:, :6].reshape(B, OH, OW, 6))           # (B, 14, 14, 6) bf16

    # x = pool(relu(conv2(x)))
    p, (B, OH, OW) = _im2col_nhwc(x, 5, 5)                        # (B*10*10, 150) bf16
    y = matmul_bias_act(p, prepared["c2_w"], prepared["c2_b"], apply_relu=True)
    x = maxpool2x2_nhwc(y[:, :16].reshape(B, OH, OW, 16))         # (B, 5, 5, 16) bf16

    # x = fc3(relu(fc2(relu(fc1(x.view(-1, 400)))))) -- single fused kernel.
    # NHWC flatten is matched by the fc1 row permutation done in prepare_params.
    x = x.reshape(B, 5 * 5 * 16)
    logits = fc_fused(x, prepared)                                # (B, 128) f32
    return logits[:, :10]


def net_reference(params, x):
    """Pure-JAX (XLA) reference mirroring the kernel's bf16-input / f32-accumulate
    quantization points, so the check validates layout/indexing/fusion."""
    bf16 = jnp.bfloat16

    def conv(x, w, b):
        y = jax.lax.conv_general_dilated(
            x.astype(bf16), w.astype(bf16), window_strides=(1, 1), padding="VALID",
            dimension_numbers=("NCHW", "OIHW", "NCHW"),
            preferred_element_type=jnp.float32)
        return jax.nn.relu(y + b[None, :, None, None]).astype(bf16)

    def pool(x):  # NCHW 2x2/2 maxpool
        a = jnp.maximum(x[:, :, 0::2, 0::2], x[:, :, 0::2, 1::2])
        b = jnp.maximum(x[:, :, 1::2, 0::2], x[:, :, 1::2, 1::2])
        return jnp.maximum(a, b)

    x = pool(conv(x, params["conv1_w"], params["conv1_b"]))
    x = pool(conv(x, params["conv2_w"], params["conv2_b"]))
    x = x.reshape(-1, 16 * 5 * 5)
    h = jnp.dot(x.astype(bf16), params["fc1_w"].astype(bf16),
                preferred_element_type=jnp.float32)
    h = jax.nn.relu(h + params["fc1_b"]).astype(bf16)
    h = jnp.dot(h, params["fc2_w"].astype(bf16), preferred_element_type=jnp.float32)
    h = jax.nn.relu(h + params["fc2_b"]).astype(bf16)
    h = jnp.dot(h, params["fc3_w"].astype(bf16), preferred_element_type=jnp.float32)
    return h + params["fc3_b"]


if __name__ == "__main__":
    key = jax.random.PRNGKey(0)
    k_params, k_x = jax.random.split(key)
    params = init_params(k_params)
    prepared = prepare_params(params)   # one-time weight layout/padding/bf16 prep

    # Input implied by the module: fc1 expects 16*5*5, i.e. 32x32 RGB images.
    x = jax.random.normal(k_x, (2, 3, 32, 32), dtype=jnp.float32)

    out = jax.block_until_ready(net_forward(prepared, x))
    assert out.shape == (2, 10), out.shape

    ref = net_reference(params, x)
    if not jnp.allclose(out, ref, atol=1e-2, rtol=1e-2):
        err = float(jnp.max(jnp.abs(out - ref)))
        raise AssertionError(f"Pallas output does not match reference (max abs err {err})")

    print("KERNEL_OK")
</pallas_src>

<mosaic_0001>
module attributes {stable_mosaic.version = 11 : i64} {
  func.func @_matmul_bias_act_kernel(%arg0: i32, %arg1: memref<784x75xbf16, #tpu.memory_space<vmem>>, %arg2: memref<75x128xbf16, #tpu.memory_space<vmem>>, %arg3: memref<1x128xf32, #tpu.memory_space<vmem>>, %arg4: memref<784x128xbf16, #tpu.memory_space<vmem>>) attributes {dimension_semantics = [#tpu.dimension_semantics<parallel>], iteration_bounds = array<i64: 2>, scalar_prefetch = 0 : i64, scratch_operands = 0 : i64, tpu.core_type = #tpu.core_type<tc>, window_params = [{transform_indices = @transform_0, window_bounds = array<i64: 784, 75>}, {pipeline_mode = #tpu.pipeline_mode<synchronous>, transform_indices = @transform_1, window_bounds = array<i64: 75, 128>}, {pipeline_mode = #tpu.pipeline_mode<synchronous>, transform_indices = @transform_2, window_bounds = array<i64: 1, 128>}, {transform_indices = @transform_3, window_bounds = array<i64: 784, 128>}]} {
    %c0 = arith.constant 0 : index
    %c0_0 = arith.constant 0 : index
    %0 = vector.load %arg1[%c0, %c0_0] : memref<784x75xbf16, #tpu.memory_space<vmem>>, vector<784x75xbf16>
    %c0_1 = arith.constant 0 : index
    %c0_2 = arith.constant 0 : index
    %1 = vector.load %arg2[%c0_1, %c0_2] : memref<75x128xbf16, #tpu.memory_space<vmem>>, vector<75x128xbf16>
    %cst = arith.constant dense<0.000000e+00> : vector<784x128xf32>
    %2 = tpu.matmul %0, %1, %cst {dimension_numbers = #tpu.dot_dimension_numbers<[1], [0], [0], [1], [0, 0, 1, 1], [], []>} : vector<784x75xbf16>, vector<75x128xbf16>, vector<784x128xf32> -> vector<784x128xf32>
    %c0_3 = arith.constant 0 : index
    %c0_4 = arith.constant 0 : index
    %3 = vector.load %arg3[%c0_3, %c0_4] : memref<1x128xf32, #tpu.memory_space<vmem>>, vector<1x128xf32>
    %4 = vector.broadcast %3 : vector<1x128xf32> to vector<784x128xf32>
    %5 = arith.addf %2, %4 : vector<784x128xf32>
    %cst_5 = arith.constant 0.000000e+00 : f32
    %6 = vector.broadcast %cst_5 : f32 to vector<784x128xf32>
    %7 = arith.maximumf %5, %6 : vector<784x128xf32>
    %8 = arith.truncf %7 : vector<784x128xf32> to vector<784x128xbf16>
    %c0_6 = arith.constant 0 : index
    %c0_7 = arith.constant 0 : index
    %9 = vector.load %arg4[%c0_6, %c0_7] : memref<784x128xbf16, #tpu.memory_space<vmem>>, vector<784x128xbf16>
    tpu.vector_store %arg4[%c0_6, %c0_7], %8 {strides = array<i32>} : memref<784x128xbf16, #tpu.memory_space<vmem>>, vector<784x128xbf16>,
    return
  }
  func.func @transform_0(%arg0: i32) -> (i32, i32) {
    %c0_i32 = arith.constant 0 : i32
    %c0_i32_0 = arith.constant 0 : i32
    return %arg0, %c0_i32 : i32, i32
  }
  func.func @transform_1(%arg0: i32) -> (i32, i32) {
    %c0_i32 = arith.constant 0 : i32
    %c0_i32_0 = arith.constant 0 : i32
    %c0_i32_1 = arith.constant 0 : i32
    return %c0_i32, %c0_i32_0 : i32, i32
  }
  func.func @transform_2(%arg0: i32) -> (i32, i32) {
    %c0_i32 = arith.constant 0 : i32
    %c0_i32_0 = arith.constant 0 : i32
    %c0_i32_1 = arith.constant 0 : i32
    return %c0_i32, %c0_i32_0 : i32, i32
  }
  func.func @transform_3(%arg0: i32) -> (i32, i32) {
    %c0_i32 = arith.constant 0 : i32
    %c0_i32_0 = arith.constant 0 : i32
    return %arg0, %c0_i32 : i32, i32
  }
}

module attributes {stable_mosaic.version = 11 : i64} {
  func.func @_matmul_bias_act_kernel(%arg0: i32, %arg1: memref<40x150xbf16, #tpu.memory_space<vmem>>, %arg2: memref<150x128xbf16, #tpu.memory_space<vmem>>, %arg3: memref<1x128xf32, #tpu.memory_space<vmem>>, %arg4: memref<40x128xbf16, #tpu.memory_space<vmem>>) attributes {dimension_semantics = [#tpu.dimension_semantics<parallel>], iteration_bounds = array<i64: 5>, scalar_prefetch = 0 : i64, scratch_operands = 0 : i64, tpu.core_type = #tpu.core_type<tc>, window_params = [{transform_indices = @transform_0, window_bounds = array<i64: 40, 150>}, {pipeline_mode = #tpu.pipeline_mode<synchronous>, transform_indices = @transform_1, window_bounds = array<i64: 150, 128>}, {pipeline_mode = #tpu.pipeline_mode<synchronous>, transform_indices = @transform_2, window_bounds = array<i64: 1, 128>}, {transform_indices = @transform_3, window_bounds = array<i64: 40, 128>}]} {
    %c0 = arith.constant 0 : index
    %c0_0 = arith.constant 0 : index
    %0 = vector.load %arg1[%c0, %c0_0] : memref<40x150xbf16, #tpu.memory_space<vmem>>, vector<40x150xbf16>
    %c0_1 = arith.constant 0 : index
    %c0_2 = arith.constant 0 : index
    %1 = vector.load %arg2[%c0_1, %c0_2] : memref<150x128xbf16, #tpu.memory_space<vmem>>, vector<150x128xbf16>
    %cst = arith.constant dense<0.000000e+00> : vector<40x128xf32>
    %2 = tpu.matmul %0, %1, %cst {dimension_numbers = #tpu.dot_dimension_numbers<[1], [0], [0], [1], [0, 0, 1, 1], [], []>} : vector<40x150xbf16>, vector<150x128xbf16>, vector<40x128xf32> -> vector<40x128xf32>
    %c0_3 = arith.constant 0 : index
    %c0_4 = arith.constant 0 : index
    %3 = vector.load %arg3[%c0_3, %c0_4] : memref<1x128xf32, #tpu.memory_space<vmem>>, vector<1x128xf32>
    %4 = vector.broadcast %3 : vector<1x128xf32> to vector<40x128xf32>
    %5 = arith.addf %2, %4 : vector<40x128xf32>
    %cst_5 = arith.constant 0.000000e+00 : f32
    %6 = vector.broadcast %cst_5 : f32 to vector<40x128xf32>
    %7 = arith.maximumf %5, %6 : vector<40x128xf32>
    %8 = arith.truncf %7 : vector<40x128xf32> to vector<40x128xbf16>
    %c0_6 = arith.constant 0 : index
    %c0_7 = arith.constant 0 : index
    %9 = vector.load %arg4[%c0_6, %c0_7] : memref<40x128xbf16, #tpu.memory_space<vmem>>, vector<40x128xbf16>
    tpu.vector_store %arg4[%c0_6, %c0_7], %8 {strides = array<i32>} : memref<40x128xbf16, #tpu.memory_space<vmem>>, vector<40x128xbf16>,
    return
  }
  func.func @transform_0(%arg0: i32) -> (i32, i32) {
    %c0_i32 = arith.constant 0 : i32
    %c0_i32_0 = arith.constant 0 : i32
    return %arg0, %c0_i32 : i32, i32
  }
  func.func @transform_1(%arg0: i32) -> (i32, i32) {
    %c0_i32 = arith.constant 0 : i32
    %c0_i32_0 = arith.constant 0 : i32
    %c0_i32_1 = arith.constant 0 : i32
    return %c0_i32, %c0_i32_0 : i32, i32
  }
  func.func @transform_2(%arg0: i32) -> (i32, i32) {
    %c0_i32 = arith.constant 0 : i32
    %c0_i32_0 = arith.constant 0 : i32
    %c0_i32_1 = arith.constant 0 : i32
    return %c0_i32, %c0_i32_0 : i32, i32
  }
  func.func @transform_3(%arg0: i32) -> (i32, i32) {
    %c0_i32 = arith.constant 0 : i32
    %c0_i32_0 = arith.constant 0 : i32
    return %arg0, %c0_i32 : i32, i32
  }
}

module attributes {stable_mosaic.version = 11 : i64} {
  func.func @_fc_fused_kernel(%arg0: i32, %arg1: memref<2x400xbf16, #tpu.memory_space<vmem>>, %arg2: memref<400x128xbf16, #tpu.memory_space<vmem>>, %arg3: memref<1x128xf32, #tpu.memory_space<vmem>>, %arg4: memref<128x128xbf16, #tpu.memory_space<vmem>>, %arg5: memref<1x128xf32, #tpu.memory_space<vmem>>, %arg6: memref<128x128xbf16, #tpu.memory_space<vmem>>, %arg7: memref<1x128xf32, #tpu.memory_space<vmem>>, %arg8: memref<2x128xf32, #tpu.memory_space<vmem>>) attributes {dimension_semantics = [#tpu.dimension_semantics<parallel>], iteration_bounds = array<i64: 1>, scalar_prefetch = 0 : i64, scratch_operands = 0 : i64, tpu.core_type = #tpu.core_type<tc>, window_params = [{transform_indices = @transform_0, window_bounds = array<i64: 2, 400>}, {pipeline_mode = #tpu.pipeline_mode<synchronous>, transform_indices = @transform_1, window_bounds = array<i64: 400, 128>}, {pipeline_mode = #tpu.pipeline_mode<synchronous>, transform_indices = @transform_2, window_bounds = array<i64: 1, 128>}, {pipeline_mode = #tpu.pipeline_mode<synchronous>, transform_indices = @transform_3, window_bounds = array<i64: 128, 128>}, {pipeline_mode = #tpu.pipeline_mode<synchronous>, transform_indices = @transform_4, window_bounds = array<i64: 1, 128>}, {pipeline_mode = #tpu.pipeline_mode<synchronous>, transform_indices = @transform_5, window_bounds = array<i64: 128, 128>}, {pipeline_mode = #tpu.pipeline_mode<synchronous>, transform_indices = @transform_6, window_bounds = array<i64: 1, 128>}, {transform_indices = @transform_7, window_bounds = array<i64: 2, 128>}]} {
    %c0 = arith.constant 0 : index
    %c0_0 = arith.constant 0 : index
    %0 = vector.load %arg1[%c0, %c0_0] : memref<2x400xbf16, #tpu.memory_space<vmem>>, vector<2x400xbf16>
    %c0_1 = arith.constant 0 : index
    %c0_2 = arith.constant 0 : index
    %1 = vector.load %arg2[%c0_1, %c0_2] : memref<400x128xbf16, #tpu.memory_space<vmem>>, vector<400x128xbf16>
    %cst = arith.constant dense<0.000000e+00> : vector<2x128xf32>
    %2 = tpu.matmul %0, %1, %cst {dimension_numbers = #tpu.dot_dimension_numbers<[1], [0], [0], [1], [0, 0, 1, 1], [], []>} : vector<2x400xbf16>, vector<400x128xbf16>, vector<2x128xf32> -> vector<2x128xf32>
    %c0_3 = arith.constant 0 : index
    %c0_4 = arith.constant 0 : index
    %3 = vector.load %arg3[%c0_3, %c0_4] : memref<1x128xf32, #tpu.memory_space<vmem>>, vector<1x128xf32>
    %4 = vector.broadcast %3 : vector<1x128xf32> to vector<2x128xf32>
    %5 = arith.addf %2, %4 : vector<2x128xf32>
    %cst_5 = arith.constant 0.000000e+00 : f32
    %6 = vector.broadcast %cst_5 : f32 to vector<2x128xf32>
    %7 = arith.maximumf %5, %6 : vector<2x128xf32>
    %8 = arith.truncf %7 : vector<2x128xf32> to vector<2x128xbf16>
    %c0_6 = arith.constant 0 : index
    %c0_7 = arith.constant 0 : index
    %9 = vector.load %arg4[%c0_6, %c0_7] : memref<128x128xbf16, #tpu.memory_space<vmem>>, vector<128x128xbf16>
    %cst_8 = arith.constant dense<0.000000e+00> : vector<2x128xf32>
    %10 = tpu.matmul %8, %9, %cst_8 {dimension_numbers = #tpu.dot_dimension_numbers<[1], [0], [0], [1], [0, 0, 1, 1], [], []>} : vector<2x128xbf16>, vector<128x128xbf16>, vector<2x128xf32> -> vector<2x128xf32>
    %c0_9 = arith.constant 0 : index
    %c0_10 = arith.constant 0 : index
    %11 = vector.load %arg5[%c0_9, %c0_10] : memref<1x128xf32, #tpu.memory_space<vmem>>, vector<1x128xf32>
    %12 = vector.broadcast %11 : vector<1x128xf32> to vector<2x128xf32>
    %13 = arith.addf %10, %12 : vector<2x128xf32>
    %cst_11 = arith.constant 0.000000e+00 : f32
    %14 = vector.broadcast %cst_11 : f32 to vector<2x128xf32>
    %15 = arith.maximumf %13, %14 : vector<2x128xf32>
    %16 = arith.truncf %15 : vector<2x128xf32> to vector<2x128xbf16>
    %c0_12 = arith.constant 0 : index
    %c0_13 = arith.constant 0 : index
    %17 = vector.load %arg6[%c0_12, %c0_13] : memref<128x128xbf16, #tpu.memory_space<vmem>>, vector<128x128xbf16>
    %cst_14 = arith.constant dense<0.000000e+00> : vector<2x128xf32>
    %18 = tpu.matmul %16, %17, %cst_14 {dimension_numbers = #tpu.dot_dimension_numbers<[1], [0], [0], [1], [0, 0, 1, 1], [], []>} : vector<2x128xbf16>, vector<128x128xbf16>, vector<2x128xf32> -> vector<2x128xf32>
    %c0_15 = arith.constant 0 : index
    %c0_16 = arith.constant 0 : index
    %19 = vector.load %arg7[%c0_15, %c0_16] : memref<1x128xf32, #tpu.memory_space<vmem>>, vector<1x128xf32>
    %20 = vector.broadcast %19 : vector<1x128xf32> to vector<2x128xf32>
    %21 = arith.addf %18, %20 : vector<2x128xf32>
    %c0_17 = arith.constant 0 : index
    %c0_18 = arith.constant 0 : index
    %22 = vector.load %arg8[%c0_17, %c0_18] : memref<2x128xf32, #tpu.memory_space<vmem>>, vector<2x128xf32>
    tpu.vector_store %arg8[%c0_17, %c0_18], %21 {strides = array<i32>} : memref<2x128xf32, #tpu.memory_space<vmem>>, vector<2x128xf32>,
    return
  }
  func.func @transform_0(%arg0: i32) -> (i32, i32) {
    %c0_i32 = arith.constant 0 : i32
    %c0_i32_0 = arith.constant 0 : i32
    return %arg0, %c0_i32 : i32, i32
  }
  func.func @transform_1(%arg0: i32) -> (i32, i32) {
    %c0_i32 = arith.constant 0 : i32
    %c0_i32_0 = arith.constant 0 : i32
    %c0_i32_1 = arith.constant 0 : i32
    return %c0_i32, %c0_i32_0 : i32, i32
  }
  func.func @transform_2(%arg0: i32) -> (i32, i32) {
    %c0_i32 = arith.constant 0 : i32
    %c0_i32_0 = arith.constant 0 : i32
    %c0_i32_1 = arith.constant 0 : i32
    return %c0_i32, %c0_i32_0 : i32, i32
  }
  func.func @transform_3(%arg0: i32) -> (i32, i32) {
    %c0_i32 = arith.constant 0 : i32
    %c0_i32_0 = arith.constant 0 : i32
    %c0_i32_1 = arith.constant 0 : i32
    return %c0_i32, %c0_i32_0 : i32, i32
  }
  func.func @transform_4(%arg0: i32) -> (i32, i32) {
    %c0_i32 = arith.constant 0 : i32
    %c0_i32_0 = arith.constant 0 : i32
    %c0_i32_1 = arith.constant 0 : i32
    return %c0_i32, %c0_i32_0 : i32, i32
  }
  func.func @transform_5(%arg0: i32) -> (i32, i32) {
    %c0_i32 = arith.constant 0 : i32
    %c0_i32_0 = arith.constant 0 : i32
    %c0_i32_1 = arith.constant 0 : i32
    return %c0_i32, %c0_i32_0 : i32, i32
  }
  func.func @transform_6(%arg0: i32) -> (i32, i32) {
    %c0_i32 = arith.constant 0 : i32
    %c0_i32_0 = arith.constant 0 : i32
    %c0_i32_1 = arith.constant 0 : i32
    return %c0_i32, %c0_i32_0 : i32, i32
  }
  func.func @transform_7(%arg0: i32) -> (i32, i32) {
    %c0_i32 = arith.constant 0 : i32
    %c0_i32_0 = arith.constant 0 : i32
    return %arg0, %c0_i32 : i32, i32
  }
}

</mosaic_0001>

<bundles_post_ra>
// kernel: net_forward.3
= control target key start
LH: loop header
LB: loop body
LE: loop exit
PB: predicated region body
PF: predicated region fallthrough
CT: control target
= control target key end

     0   :  { %s2756_s12 = smov 0   ;;  %s3157_s0 = inlined_call_operand.vmem [shape: bf16[1568,75], index: 0, kind: input, shape index: {}]   ;;  %s3158_s1 = inlined_call_operand.vmem [shape: bf16[75,128], index: 1, kind: input, shape index: {}]   ;;  %s3159_s2 = inlined_call_operand.vmem [shape: f32[1,128], index: 2, kind: input, shape index: {}]   ;;  %s3160_s3 = inlined_call_operand.vmem [shape: bf16[1568,128], index: 3, kind: output, shape index: {}]  }
   0x1 LB: > { %s1788_s13 = sadd.s32 4294967295, %s2731_s12   ;;  %p1792_p0 = scmp.ge.s32.totalorder %s2731_s12, 1  ;;  %s2731_s12 = sphi %s2756_s12, %s13_s12  }
   0x2   : > { %p138_p1 = scmp.lt.s32.totalorder %s2731_s12, 3 }
   0x4   : > { %p139_p2 = pnand %p1792_p0, %p138_p1 }
   0x5   : > { %v2671_v0 = vld [vmem:[%s3158_s1] sm:$0xff] (!%p139_p2)   ;;  %v2733_v1 = vmov (!%p139_p2), 0.0   ;;  %v2672_v2 = vld [vmem:[%s3158_s1 + $0x8] sm:$0xff] (!%p139_p2)   ;;  %vm712_vm0 = vcmask (!%p139_p2), 1044480   ;;  %s162_s18 = smul.u32 (!%p139_p2), 98, %s1788_s13  ;;  %v2673_v3 = vld [vmem:[%s3158_s1 + $0x10] sm:$0xff] (!%p139_p2)  }
   0x6   : > { %142 = sbr.rel (%p139_p2) target bundleno = 439 (0x1b7), region = 32  ;;  %2444 = vmatprep.subr.bf16.mxu0 (!%p139_p2), %v2733_v1  ;;  %2650 = vmatprep.subr.bf16.mxu1 (!%p139_p2), %v2733_v1  ;;  %vm713_vm1 = vcmask (!%p139_p2), 1045504   ;;  %v2734_v4 = vmov (!%p139_p2), 65535   ;;  %vm2735_vm2 = vmmov (!%p139_p2), 0   ;;  %v2674_v6 = vld [vmem:[%s3158_s1 + $0x18] sm:$0xff] (!%p139_p2)   ;;  %vm564_vm3 = vcmask (!%p139_p2), 613376  }
   0x7   : > { %2445 = vmatpush3.bf16.msra.mxu0 (!%p139_p2), %v2671_v0  ;;  %2655 = vmatpush3.bf16.msra.mxu1 (!%p139_p2), %v2671_v0  ;;  %p163_p3 = scmp.lt.s32.totalorder (!%p139_p2), %s162_s18, 195  ;;  %v714_v5 = vsel (!%p139_p2), %vm712_vm0, 4294967295, %v2734_v4  ;;  %v2675_v7 = vld [vmem:[%s3158_s1 + $0x20] sm:$0x3f] (!%p139_p2)  }
   0x8   : > { %2446 = vmatprep.subr.bf16.mxu0 (!%p139_p2), %v2733_v1  ;;  %2651 = vmatprep.subr.bf16.mxu1 (!%p139_p2), %v2733_v1  ;;  %v715_v8 = vsel (!%p139_p2), %vm713_vm1, %v714_v5, 0  ;;  %v2998_v59 = vld [vmem:[%s3159_s2] ss:$0 sm:$0xff] (!%p139_p2) }
   0x9   : > { %2454 = vmatprep.mubr.msk.bf16.mxu0 (!%p139_p2), %vm2735_vm2, %v2733_v1  ;;  %2554 = vmatprep.mubr.msk.bf16.mxu1 (!%p139_p2), %vm2735_vm2, %v2733_v1  ;;  %v717_v9 = vand.u32 (!%p139_p2), %v2675_v7, %v715_v8 }
   0xb   : > { %2447 = vmatpush3.bf16.msra.mxu0 (!%p139_p2), %v2672_v2  ;;  %2656 = vmatpush3.bf16.msra.mxu1 (!%p139_p2), %v2672_v2 }
   0xc   : > { %2448 = vmatprep.subr.bf16.mxu0 (!%p139_p2), %v2733_v1  ;;  %2652 = vmatprep.subr.bf16.mxu1 (!%p139_p2), %v2733_v1 }
   0xd   : > { %s3162_s18 = smov (!%p163_p3, %s162_s18), 195 }
   0xe   : > { %s1793_s25 = sshll.u32 %s3162_s18, 2 }
   0xf   : > { %2449 = vmatpush3.bf16.msra.mxu0 %v2673_v3  ;;  %2657 = vmatpush3.bf16.msra.mxu1 %v2673_v3  ;;  %s2799_s28 = scalar_lea.vmem %s3157_s0, %s1793_s25  ;;  %s3009_s6 = scalar_lea.vmem %s3160_s3, %s1793_s25 }
  0x10   : > { %2450 = vmatprep.subr.bf16.mxu0 %v2733_v1  ;;  %2653 = vmatprep.subr.bf16.mxu1 %v2733_v1  ;;  %v2676_v10 = vld [vmem:[%s2799_s28] sm:$0xff]   ;;  %v2677_v11 = vld [vmem:[%s2799_s28 + $0xc8] sm:$0xff]   ;;  %v2679_v13 = vld [vmem:[%s2799_s28 + $0xd0] sm:$0xff]  }
  0x11   : > { %v2678_v12 = vld [vmem:[%s2799_s28 + $0x8] sm:$0xff]   ;;  %v2680_v14 = vld [vmem:[%s2799_s28 + $0x10] sm:$0xff]   ;;  %v2681_v15 = vld [vmem:[%s2799_s28 + $0xd8] sm:$0xff]  }
  0x12   : > { %v2682_v16 = vld [vmem:[%s2799_s28 + $0x18] sm:$0xff]   ;;  %v2683_v17 = vld [vmem:[%s2799_s28 + $0xe0] sm:$0xff]   ;;  %v2685_v19 = vld [vmem:[%s2799_s28 + $0xe8] sm:$0xff]  }
  0x13   : > { %2451 = vmatpush3.bf16.msra.mxu0 %v2674_v6  ;;  %2658 = vmatpush3.bf16.msra.mxu1 %v2674_v6  ;;  %v2684_v18 = vld [vmem:[%s2799_s28 + $0x20] sm:$0xff]   ;;  %v2686_v20 = vld [vmem:[%s2799_s28 + $0x28] sm:$0xff]   ;;  %v2687_v21 = vld [vmem:[%s2799_s28 + $0xf0] sm:$0xff]  }
  0x14   : > { %2452 = vmatprep.subr.bf16.mxu0 %v2733_v1  ;;  %2654 = vmatprep.subr.bf16.mxu1 %v2733_v1  ;;  %v2688_v22 = vld [vmem:[%s2799_s28 + $0x30] sm:$0xff]   ;;  %v2689_v23 = vld [vmem:[%s2799_s28 + $0xf8] sm:$0xff]   ;;  %v2691_v25 = vld [vmem:[%s2799_s28 + $0x100] sm:$0xff]  }
  0x15   : > { %v2690_v24 = vld [vmem:[%s2799_s28 + $0x38] sm:$0xff]   ;;  %v2692_v26 = vld [vmem:[%s2799_s28 + $0x40] sm:$0xff]   ;;  %v2693_v27 = vld [vmem:[%s2799_s28 + $0x108] sm:$0xff]  }
  0x16   : > { %v2694_v28 = vld [vmem:[%s2799_s28 + $0x48] sm:$0xff]   ;;  %v2695_v29 = vld [vmem:[%s2799_s28 + $0x110] sm:$0xff]   ;;  %v2697_v31 = vld [vmem:[%s2799_s28 + $0x118] sm:$0xff]  }
  0x17   : > { %2453 = vmatpush3.bf16.msra.mxu0 %v717_v9  ;;  %2659 = vmatpush3.bf16.msra.mxu1 %v717_v9  ;;  %v2696_v30 = vld [vmem:[%s2799_s28 + $0x50] sm:$0xff]   ;;  %v2698_v32 = vld [vmem:[%s2799_s28 + $0x58] sm:$0xff]   ;;  %v2699_v33 = vld [vmem:[%s2799_s28 + $0x120] sm:$0xff]  }
  0x18   : > { %v2700_v34 = vld [vmem:[%s2799_s28 + $0x60] sm:$0xff]   ;;  %v2701_v35 = vld [vmem:[%s2799_s28 + $0x128] sm:$0xff]   ;;  %v2703_v37 = vld [vmem:[%s2799_s28 + $0x130] sm:$0xff]  }
  0x19   : > { %v2702_v36 = vld [vmem:[%s2799_s28 + $0x68] sm:$0xff]   ;;  %v2704_v38 = vld [vmem:[%s2799_s28 + $0x70] sm:$0xff]   ;;  %v2705_v39 = vld [vmem:[%s2799_s28 + $0x138] sm:$0xff]  }
  0x1a   : > { %2455 = vmatmul.mubr.msk.bf16.vlgmr.msra.gmra.mrb[0].mxu0 %vm564_vm3, %v2676_v10  ;;  %2555 = vmatmul.mubr.msk.bf16.vlgmr.msra.gmra.mrb[0].mxu1 %vm564_vm3, %v2677_v11  ;;  %v2706_v40 = vld [vmem:[%s2799_s28 + $0x78] sm:$0xff]   ;;  %v2707_v41 = vld [vmem:[%s2799_s28 + $0x140] sm:$0xff]   ;;  %v2709_v43 = vld [vmem:[%s2799_s28 + $0x148] sm:$0xff]  }
  0x1b   : > { %2458 = vmatprep.mubr.msk.bf16.mxu0 %vm2735_vm2, %v2733_v1  ;;  %2558 = vmatprep.mubr.msk.bf16.mxu1 %vm2735_vm2, %v2733_v1  ;;  %v2708_v42 = vld [vmem:[%s2799_s28 + $0x80] sm:$0xff]   ;;  %v2710_v44 = vld [vmem:[%s2799_s28 + $0x88] sm:$0xff]   ;;  %v2711_v45 = vld [vmem:[%s2799_s28 + $0x150] sm:$0xff]  }
  0x1c   : > { %v2712_v46 = vld [vmem:[%s2799_s28 + $0x90] sm:$0xff]   ;;  %v2713_v47 = vld [vmem:[%s2799_s28 + $0x158] sm:$0xff]   ;;  %v2715_v49 = vld [vmem:[%s2799_s28 + $0x160] sm:$0xff]  }
  0x1d   : > { %v2714_v48 = vld [vmem:[%s2799_s28 + $0x98] sm:$0xff]   ;;  %v2716_v50 = vld [vmem:[%s2799_s28 + $0xa0] sm:$0xff]   ;;  %v2717_v51 = vld [vmem:[%s2799_s28 + $0x168] sm:$0xff]  }
  0x1e   : > { %v2718_v52 = vld [vmem:[%s2799_s28 + $0xa8] sm:$0xff]   ;;  %v2719_v53 = vld [vmem:[%s2799_s28 + $0x170] sm:$0xff]   ;;  %v2721_v55 = vld [vmem:[%s2799_s28 + $0x178] sm:$0xff]  }
  0x1f   : > { %v2720_v54 = vld [vmem:[%s2799_s28 + $0xb0] sm:$0xff]   ;;  %v2722_v56 = vld [vmem:[%s2799_s28 + $0xb8] sm:$0xff]   ;;  %v2723_v57 = vld [vmem:[%s2799_s28 + $0x180] sm:$0xff]  }
  0x20   : > { %v2724_v58 = vld [vmem:[%s2799_s28 + $0xc0] sm:$0xff]  }
  0x22   : > { %2459 = vmatmul.mubr.msk.bf16.gmra.mrb[4].mxu0 %vm564_vm3, %v2678_v12  ;;  %2559 = vmatmul.mubr.msk.bf16.gmra.mrb[4].mxu1 %vm564_vm3, %v2679_v13 }
  0x23   : > { %2462 = vmatprep.mubr.msk.bf16.mxu0 %vm2735_vm2, %v2733_v1  ;;  %2562 = vmatprep.mubr.msk.bf16.mxu1 %vm2735_vm2, %v2733_v1 }
  0x2a   : > { %2463 = vmatmul.mubr.msk.bf16.gmra.mrb[8].mxu0 %vm564_vm3, %v2680_v14  ;;  %2563 = vmatmul.mubr.msk.bf16.gmra.mrb[8].mxu1 %vm564_vm3, %v2681_v15 }
  0x2b   : > { %2466 = vmatprep.mubr.msk.bf16.mxu0 %vm2735_vm2, %v2733_v1  ;;  %2566 = vmatprep.mubr.msk.bf16.mxu1 %vm2735_vm2, %v2733_v1 }
  0x32   : > { %2467 = vmatmul.mubr.msk.bf16.gmra.mrb[12].mxu0 %vm564_vm3, %v2682_v16  ;;  %2567 = vmatmul.mubr.msk.bf16.gmra.mrb[12].mxu1 %vm564_vm3, %v2683_v17 }
  0x33   : > { %2470 = vmatprep.mubr.msk.bf16.mxu0 %vm2735_vm2, %v2733_v1  ;;  %2570 = vmatprep.mubr.msk.bf16.mxu1 %vm2735_vm2, %v2733_v1 }
  0x3a   : > { %2471 = vmatmul.mubr.msk.bf16.gmra.mrb[16].mxu0 %vm564_vm3, %v2684_v18  ;;  %2571 = vmatmul.mubr.msk.bf16.gmra.mrb[16].mxu1 %vm564_vm3, %v2685_v19 }
  0x3b   : > { %2474 = vmatprep.mubr.msk.bf16.mxu0 %vm2735_vm2, %v2733_v1  ;;  %2574 = vmatprep.mubr.msk.bf16.mxu1 %vm2735_vm2, %v2733_v1 }
  0x42   : > { %2475 = vmatmul.mubr.msk.bf16.gmra.mrb[20].mxu0 %vm564_vm3, %v2686_v20  ;;  %2575 = vmatmul.mubr.msk.bf16.gmra.mrb[20].mxu1 %vm564_vm3, %v2687_v21 }
  0x43   : > { %2478 = vmatprep.mubr.msk.bf16.mxu0 %vm2735_vm2, %v2733_v1  ;;  %2578 = vmatprep.mubr.msk.bf16.mxu1 %vm2735_vm2, %v2733_v1 }
  0x4a   : > { %2479 = vmatmul.mubr.msk.bf16.gmra.mrb[24].mxu0 %vm564_vm3, %v2688_v22  ;;  %2579 = vmatmul.mubr.msk.bf16.gmra.mrb[24].mxu1 %vm564_vm3, %v2689_v23 }
  0x4b   : > { %2482 = vmatprep.mubr.msk.bf16.mxu0 %vm2735_vm2, %v2733_v1  ;;  %2582 = vmatprep.mubr.msk.bf16.mxu1 %vm2735_vm2, %v2733_v1 }
  0x52   : > { %2483 = vmatmul.mubr.msk.bf16.gmra.mrb[28].mxu0 %vm564_vm3, %v2690_v24  ;;  %2583 = vmatmul.mubr.msk.bf16.gmra.mrb[28].mxu1 %vm564_vm3, %v2691_v25 }
  0x53   : > { %2486 = vmatprep.mubr.msk.bf16.mxu0 %vm2735_vm2, %v2733_v1  ;;  %2586 = vmatprep.mubr.msk.bf16.mxu1 %vm2735_vm2, %v2733_v1 }
  0x5a   : > { %2487 = vmatmul.mubr.msk.bf16.gmra.mrb[32].mxu0 %vm564_vm3, %v2692_v26  ;;  %2587 = vmatmul.mubr.msk.bf16.gmra.mrb[32].mxu1 %vm564_vm3, %v2693_v27 }
  0x5b   : > { %2490 = vmatprep.mubr.msk.bf16.mxu0 %vm2735_vm2, %v2733_v1  ;;  %2590 = vmatprep.mubr.msk.bf16.mxu1 %vm2735_vm2, %v2733_v1 }
  0x62   : > { %2491 = vmatmul.mubr.msk.bf16.gmra.mrb[36].mxu0 %vm564_vm3, %v2694_v28  ;;  %2591 = vmatmul.mubr.msk.bf16.gmra.mrb[36].mxu1 %vm564_vm3, %v2695_v29 }
  0x63   : > { %2494 = vmatprep.mubr.msk.bf16.mxu0 %vm2735_vm2, %v2733_v1  ;;  %2594 = vmatprep.mubr.msk.bf16.mxu1 %vm2735_vm2, %v2733_v1 }
  0x6a   : > { %2495 = vmatmul.mubr.msk.bf16.gmra.mrb[40].mxu0 %vm564_vm3, %v2696_v30  ;;  %2595 = vmatmul.mubr.msk.bf16.gmra.mrb[40].mxu1 %vm564_vm3, %v2697_v31 }
  0x6b   : > { %2498 = vmatprep.mubr.msk.bf16.mxu0 %vm2735_vm2, %v2733_v1  ;;  %2598 = vmatprep.mubr.msk.bf16.mxu1 %vm2735_vm2, %v2733_v1 }
  0x72   : > { %2499 = vmatmul.mubr.msk.bf16.gmra.mrb[44].mxu0 %vm564_vm3, %v2698_v32  ;;  %2599 = vmatmul.mubr.msk.bf16.gmra.mrb[44].mxu1 %vm564_vm3, %v2699_v33 }
  0x73   : > { %2502 = vmatprep.mubr.msk.bf16.mxu0 %vm2735_vm2, %v2733_v1  ;;  %2602 = vmatprep.mubr.msk.bf16.mxu1 %vm2735_vm2, %v2733_v1 }
  0x7a   : > { %2503 = vmatmul.mubr.msk.bf16.gmra.mrb[48].mxu0 %vm564_vm3, %v2700_v34  ;;  %2603 = vmatmul.mubr.msk.bf16.gmra.mrb[48].mxu1 %vm564_vm3, %v2701_v35 }
  0x7b   : > { %2506 = vmatprep.mubr.msk.bf16.mxu0 %vm2735_vm2, %v2733_v1  ;;  %2606 = vmatprep.mubr.msk.bf16.mxu1 %vm2735_vm2, %v2733_v1 }
  0x82   : > { %2507 = vmatmul.mubr.msk.bf16.gmra.mrb[52].mxu0 %vm564_vm3, %v2702_v36  ;;  %2607 = vmatmul.mubr.msk.bf16.gmra.mrb[52].mxu1 %vm564_vm3, %v2703_v37 }
  0x83   : > { %2510 = vmatprep.mubr.msk.bf16.mxu0 %vm2735_vm2, %v2733_v1  ;;  %2610 = vmatprep.mubr.msk.bf16.mxu1 %vm2735_vm2, %v2733_v1 }
  0x8a   : > { %2511 = vmatmul.mubr.msk.bf16.gmra.mrb[56].mxu0 %vm564_vm3, %v2704_v38  ;;  %2611 = vmatmul.mubr.msk.bf16.gmra.mrb[56].mxu1 %vm564_vm3, %v2705_v39 }
  0x8b   : > { %2514 = vmatprep.mubr.msk.bf16.mxu0 %vm2735_vm2, %v2733_v1  ;;  %2614 = vmatprep.mubr.msk.bf16.mxu1 %vm2735_vm2, %v2733_v1 }
  0x92   : > { %2515 = vmatmul.mubr.msk.bf16.gmra.mrb[60].mxu0 %vm564_vm3, %v2706_v40  ;;  %2615 = vmatmul.mubr.msk.bf16.gmra.mrb[60].mxu1 %vm564_vm3, %v2707_v41 }
  0x93   : > { %2518 = vmatprep.mubr.msk.bf16.mxu0 %vm2735_vm2, %v2733_v1  ;;  %2618 = vmatprep.mubr.msk.bf16.mxu1 %vm2735_vm2, %v2733_v1 }
  0x9a   : > { %2519 = vmatmul.mubr.msk.bf16.gmra.mrb[64].mxu0 %vm564_vm3, %v2708_v42  ;;  %2619 = vmatmul.mubr.msk.bf16.gmra.mrb[64].mxu1 %vm564_vm3, %v2709_v43 }
  0x9b   : > { %2522 = vmatprep.mubr.msk.bf16.mxu0 %vm2735_vm2, %v2733_v1  ;;  %2622 = vmatprep.mubr.msk.bf16.mxu1 %vm2735_vm2, %v2733_v1 }
  0xa2   : > { %2523 = vmatmul.mubr.msk.bf16.gmra.mrb[68].mxu0 %vm564_vm3, %v2710_v44  ;;  %2623 = vmatmul.mubr.msk.bf16.gmra.mrb[68].mxu1 %vm564_vm3, %v2711_v45 }
  0xa3   : > { %2526 = vmatprep.mubr.msk.bf16.mxu0 %vm2735_vm2, %v2733_v1  ;;  %2626 = vmatprep.mubr.msk.bf16.mxu1 %vm2735_vm2, %v2733_v1 }
  0xaa   : > { %2527 = vmatmul.mubr.msk.bf16.gmra.mrb[72].mxu0 %vm564_vm3, %v2712_v46  ;;  %2627 = vmatmul.mubr.msk.bf16.gmra.mrb[72].mxu1 %vm564_vm3, %v2713_v47 }
  0xab   : > { %2530 = vmatprep.mubr.msk.bf16.mxu0 %vm2735_vm2, %v2733_v1  ;;  %2630 = vmatprep.mubr.msk.bf16.mxu1 %vm2735_vm2, %v2733_v1 }
  0xb2   : > { %2531 = vmatmul.mubr.msk.bf16.gmra.mrb[76].mxu0 %vm564_vm3, %v2714_v48  ;;  %2631 = vmatmul.mubr.msk.bf16.gmra.mrb[76].mxu1 %vm564_vm3, %v2715_v49 }
  0xb3   : > { %2534 = vmatprep.mubr.msk.bf16.mxu0 %vm2735_vm2, %v2733_v1  ;;  %2634 = vmatprep.mubr.msk.bf16.mxu1 %vm2735_vm2, %v2733_v1 }
  0xba   : > { %2535 = vmatmul.mubr.msk.bf16.gmra.mrb[80].mxu0 %vm564_vm3, %v2716_v50  ;;  %2635 = vmatmul.mubr.msk.bf16.gmra.mrb[80].mxu1 %vm564_vm3, %v2717_v51 }
  0xbb   : > { %2538 = vmatprep.mubr.msk.bf16.mxu0 %vm2735_vm2, %v2733_v1  ;;  %2638 = vmatprep.mubr.msk.bf16.mxu1 %vm2735_vm2, %v2733_v1 }
  0xc2   : > { %2539 = vmatmul.mubr.msk.bf16.gmra.mrb[84].mxu0 %vm564_vm3, %v2718_v52  ;;  %2639 = vmatmul.mubr.msk.bf16.gmra.mrb[84].mxu1 %vm564_vm3, %v2719_v53 }
  0xc3   : > { %2542 = vmatprep.mubr.msk.bf16.mxu0 %vm2735_vm2, %v2733_v1  ;;  %2642 = vmatprep.mubr.msk.bf16.mxu1 %vm2735_vm2, %v2733_v1 }
  0xca   : > { %2543 = vmatmul.mubr.msk.bf16.gmra.mrb[88].mxu0 %vm564_vm3, %v2720_v54  ;;  %2643 = vmatmul.mubr.msk.bf16.gmra.mrb[88].mxu1 %vm564_vm3, %v2721_v55 }
  0xcb   : > { %2546 = vmatprep.mubr.msk.bf16.mxu0 %vm2735_vm2, %v2733_v1  ;;  %2646 = vmatprep.mubr.msk.bf16.mxu1 %vm2735_vm2, %v2733_v1 }
  0xd2   : > { %2547 = vmatmul.mubr.msk.bf16.gmra.mrb[92].mxu0 %vm564_vm3, %v2722_v56  ;;  %2647 = vmatmul.mubr.msk.bf16.gmra.mrb[92].mxu1 %vm564_vm3, %v2723_v57 }
  0xd3   : > { %2550 = vmatprep.mubr.msk.bf16.mxu0 %vm2735_vm2, %v2733_v1 }
  0xda   : > { %2551 = vmatmul.mubr.msk.bf16.gmra.mrb[96].mxu0 %vm564_vm3, %v2724_v58 }
  0xed   : > { %v753_v60 = vpop.f32.mrb[0].mxu0  ;;  %v953_v61 = vpop.f32.mrb[0].mxu1 }
  0xee   : > { %v754_v62 = vadd.f32 %v2998_v59, %v753_v60  ;;  %v2456_v63 = vpop.f32.mrb[1].mxu0  ;;  %v954_v0 = vadd.f32 %v2998_v59, %v953_v61  ;;  %v2556_v2 = vpop.f32.mrb[1].mxu1 }
  0xef   : > { %v756_v3 = vpop.f32.mrb[2].mxu0  ;;  %v956_v4 = vpop.f32.mrb[2].mxu1 }
  0xf0   : > { %v757_v1 = vadd.f32 %v2998_v59, %v756_v3  ;;  %v2457_v5 = vpop.f32.mrb[3].mxu0  ;;  %v1194_v6 = vmax.f32 %v954_v0, 0.0  ;;  %v957_v7 = vadd.f32 %v2998_v59, %v956_v4  ;;  %v2557_v8 = vpop.f32.mrb[3].mxu1  ;;  %v1144_v9 = vmax.f32 %v754_v62, 0.0 }
  0xf2   : > { %v1145_v10 = vmax.f32 %v757_v1, 0.0  ;;  %v1195_v11 = vmax.f32 %v957_v7, 0.0 }
  0xf4   : > { %v2100_v12 = vpack.c.bf16 %v1145_v10, %v1144_v9  ;;  %v2225_v13 = vpack.c.bf16 %v1195_v11, %v1194_v6 }
  0xf5   : > { %v761_v14 = vpop.f32.mrb[4].mxu0  ;;  %v961_v15 = vpop.f32.mrb[4].mxu1 }
  0xf6   : > { %2101 = vst [vmem:[%s3009_s6] sm:$0xff] %v2100_v12   ;;  %2366 = vst [vmem:[%s3009_s6 + $0xc8] sm:$0xff] %v2225_v13   ;;  %v762_v16 = vadd.f32 %v2998_v59, %v761_v14  ;;  %v2460_v17 = vpop.f32.mrb[5].mxu0  ;;  %v962_v18 = vadd.f32 %v2998_v59, %v961_v15  ;;  %v2560_v19 = vpop.f32.mrb[5].mxu1 }
  0xf7   : > { %v764_v20 = vpop.f32.mrb[6].mxu0  ;;  %v964_v21 = vpop.f32.mrb[6].mxu1 }
  0xf8   : > { %v765_v22 = vadd.f32 %v2998_v59, %v764_v20  ;;  %v2461_v23 = vpop.f32.mrb[7].mxu0  ;;  %v1196_v24 = vmax.f32 %v962_v18, 0.0  ;;  %v965_v25 = vadd.f32 %v2998_v59, %v964_v21  ;;  %v2561_v26 = vpop.f32.mrb[7].mxu1  ;;  %v1146_v27 = vmax.f32 %v762_v16, 0.0 }
  0xfa   : > { %v1147_v28 = vmax.f32 %v765_v22, 0.0  ;;  %v1197_v29 = vmax.f32 %v965_v25, 0.0 }
  0xfc   : > { %v2105_v30 = vpack.c.bf16 %v1147_v28, %v1146_v27  ;;  %v2230_v31 = vpack.c.bf16 %v1197_v29, %v1196_v24 }
  0xfd   : > { %v769_v32 = vpop.f32.mrb[8].mxu0  ;;  %v969_v33 = vpop.f32.mrb[8].mxu1 }
  0xfe   : > { %2342 = vst [vmem:[%s3009_s6 + $0x8] sm:$0xff] %v2105_v30   ;;  %2367 = vst [vmem:[%s3009_s6 + $0xd0] sm:$0xff] %v2230_v31   ;;  %v770_v34 = vadd.f32 %v2998_v59, %v769_v32  ;;  %v2464_v35 = vpop.f32.mrb[9].mxu0  ;;  %v970_v36 = vadd.f32 %v2998_v59, %v969_v33  ;;  %v2564_v37 = vpop.f32.mrb[9].mxu1 }
  0xff   : > { %v772_v38 = vpop.f32.mrb[10].mxu0  ;;  %v972_v39 = vpop.f32.mrb[10].mxu1 }
 0x100   : > { %v773_v40 = vadd.f32 %v2998_v59, %v772_v38  ;;  %v2465_v41 = vpop.f32.mrb[11].mxu0  ;;  %v1198_v42 = vmax.f32 %v970_v36, 0.0  ;;  %v973_v43 = vadd.f32 %v2998_v59, %v972_v39  ;;  %v2565_v44 = vpop.f32.mrb[11].mxu1  ;;  %v1148_v45 = vmax.f32 %v770_v34, 0.0 }
 0x102   : > { %v1149_v46 = vmax.f32 %v773_v40, 0.0  ;;  %v1199_v47 = vmax.f32 %v973_v43, 0.0 }
 0x104   : > { %v2110_v48 = vpack.c.bf16 %v1149_v46, %v1148_v45  ;;  %v2235_v49 = vpack.c.bf16 %v1199_v47, %v1198_v42 }
 0x105   : > { %v777_v50 = vpop.f32.mrb[12].mxu0  ;;  %v977_v51 = vpop.f32.mrb[12].mxu1 }
 0x106   : > { %2343 = vst [vmem:[%s3009_s6 + $0x10] sm:$0xff] %v2110_v48   ;;  %2368 = vst [vmem:[%s3009_s6 + $0xd8] sm:$0xff] %v2235_v49   ;;  %v778_v52 = vadd.f32 %v2998_v59, %v777_v50  ;;  %v2468_v53 = vpop.f32.mrb[13].mxu0  ;;  %v978_v54 = vadd.f32 %v2998_v59, %v977_v51  ;;  %v2568_v55 = vpop.f32.mrb[13].mxu1 }
 0x107   : > { %v780_v56 = vpop.f32.mrb[14].mxu0  ;;  %v980_v57 = vpop.f32.mrb[14].mxu1 }
 0x108   : > { %v781_v58 = vadd.f32 %v2998_v59, %v780_v56  ;;  %v2469_v60 = vpop.f32.mrb[15].mxu0  ;;  %v1200_v61 = vmax.f32 %v978_v54, 0.0  ;;  %v981_v62 = vadd.f32 %v2998_v59, %v980_v57  ;;  %v2569_v63 = vpop.f32.mrb[15].mxu1  ;;  %v1150_v0 = vmax.f32 %v778_v52, 0.0 }
 0x10a   : > { %v1151_v2 = vmax.f32 %v781_v58, 0.0  ;;  %v1201_v3 = vmax.f32 %v981_v62, 0.0 }
 0x10c   : > { %v2115_v4 = vpack.c.bf16 %v1151_v2, %v1150_v0  ;;  %v2240_v1 = vpack.c.bf16 %v1201_v3, %v1200_v61 }
 0x10d   : > { %v785_v5 = vpop.f32.mrb[16].mxu0  ;;  %v985_v6 = vpop.f32.mrb[16].mxu1 }
 0x10e   : > { %2344 = vst [vmem:[%s3009_s6 + $0x18] sm:$0xff] %v2115_v4   ;;  %2369 = vst [vmem:[%s3009_s6 + $0xe0] sm:$0xff] %v2240_v1   ;;  %v786_v7 = vadd.f32 %v2998_v59, %v785_v5  ;;  %v2472_v8 = vpop.f32.mrb[17].mxu0  ;;  %v986_v9 = vadd.f32 %v2998_v59, %v985_v6  ;;  %v2572_v10 = vpop.f32.mrb[17].mxu1 }
 0x10f   : > { %v788_v11 = vpop.f32.mrb[18].mxu0  ;;  %v988_v12 = vpop.f32.mrb[18].mxu1 }
 0x110   : > { %v789_v13 = vadd.f32 %v2998_v59, %v788_v11  ;;  %v2473_v14 = vpop.f32.mrb[19].mxu0  ;;  %v1202_v15 = vmax.f32 %v986_v9, 0.0  ;;  %v989_v16 = vadd.f32 %v2998_v59, %v988_v12  ;;  %v2573_v17 = vpop.f32.mrb[19].mxu1  ;;  %v1152_v18 = vmax.f32 %v786_v7, 0.0 }
 0x112   : > { %v1153_v19 = vmax.f32 %v789_v13, 0.0  ;;  %v1203_v20 = vmax.f32 %v989_v16, 0.0 }
 0x114   : > { %v2120_v21 = vpack.c.bf16 %v1153_v19, %v1152_v18  ;;  %v2245_v22 = vpack.c.bf16 %v1203_v20, %v1202_v15 }
 0x115   : > { %v793_v23 = vpop.f32.mrb[20].mxu0  ;;  %v993_v24 = vpop.f32.mrb[20].mxu1 }
 0x116   : > { %2345 = vst [vmem:[%s3009_s6 + $0x20] sm:$0xff] %v2120_v21   ;;  %2370 = vst [vmem:[%s3009_s6 + $0xe8] sm:$0xff] %v2245_v22   ;;  %v794_v25 = vadd.f32 %v2998_v59, %v793_v23  ;;  %v2476_v26 = vpop.f32.mrb[21].mxu0  ;;  %v994_v27 = vadd.f32 %v2998_v59, %v993_v24  ;;  %v2576_v28 = vpop.f32.mrb[21].mxu1 }
 0x117   : > { %v796_v29 = vpop.f32.mrb[22].mxu0  ;;  %v996_v30 = vpop.f32.mrb[22].mxu1 }
 0x118   : > { %v797_v31 = vadd.f32 %v2998_v59, %v796_v29  ;;  %v2477_v32 = vpop.f32.mrb[23].mxu0  ;;  %v1204_v33 = vmax.f32 %v994_v27, 0.0  ;;  %v997_v34 = vadd.f32 %v2998_v59, %v996_v30  ;;  %v2577_v35 = vpop.f32.mrb[23].mxu1  ;;  %v1154_v36 = vmax.f32 %v794_v25, 0.0 }
 0x11a   : > { %v1155_v37 = vmax.f32 %v797_v31, 0.0  ;;  %v1205_v38 = vmax.f32 %v997_v34, 0.0 }
 0x11c   : > { %v2125_v39 = vpack.c.bf16 %v1155_v37, %v1154_v36  ;;  %v2250_v40 = vpack.c.bf16 %v1205_v38, %v1204_v33 }
 0x11d   : > { %v801_v41 = vpop.f32.mrb[24].mxu0  ;;  %v1001_v42 = vpop.f32.mrb[24].mxu1 }
 0x11e   : > { %2346 = vst [vmem:[%s3009_s6 + $0x28] sm:$0xff] %v2125_v39   ;;  %2371 = vst [vmem:[%s3009_s6 + $0xf0] sm:$0xff] %v2250_v40   ;;  %v802_v43 = vadd.f32 %v2998_v59, %v801_v41  ;;  %v2480_v44 = vpop.f32.mrb[25].mxu0  ;;  %v1002_v45 = vadd.f32 %v2998_v59, %v1001_v42  ;;  %v2580_v46 = vpop.f32.mrb[25].mxu1 }
 0x11f   : > { %v804_v47 = vpop.f32.mrb[26].mxu0  ;;  %v1004_v48 = vpop.f32.mrb[26].mxu1 }
 0x120   : > { %v805_v49 = vadd.f32 %v2998_v59, %v804_v47  ;;  %v2481_v50 = vpop.f32.mrb[27].mxu0  ;;  %v1206_v51 = vmax.f32 %v1002_v45, 0.0  ;;  %v1005_v52 = vadd.f32 %v2998_v59, %v1004_v48  ;;  %v2581_v53 = vpop.f32.mrb[27].mxu1  ;;  %v1156_v54 = vmax.f32 %v802_v43, 0.0 }
 0x122   : > { %v1157_v55 = vmax.f32 %v805_v49, 0.0  ;;  %v1207_v56 = vmax.f32 %v1005_v52, 0.0 }
 0x124   : > { %v2130_v57 = vpack.c.bf16 %v1157_v55, %v1156_v54  ;;  %v2255_v58 = vpack.c.bf16 %v1207_v56, %v1206_v51 }
 0x125   : > { %v809_v60 = vpop.f32.mrb[28].mxu0  ;;  %v1009_v61 = vpop.f32.mrb[28].mxu1 }
 0x126   : > { %2347 = vst [vmem:[%s3009_s6 + $0x30] sm:$0xff] %v2130_v57   ;;  %2372 = vst [vmem:[%s3009_s6 + $0xf8] sm:$0xff] %v2255_v58   ;;  %v810_v62 = vadd.f32 %v2998_v59, %v809_v60  ;;  %v2484_v63 = vpop.f32.mrb[29].mxu0  ;;  %v1010_v0 = vadd.f32 %v2998_v59, %v1009_v61  ;;  %v2584_v2 = vpop.f32.mrb[29].mxu1 }
 0x127   : > { %v812_v3 = vpop.f32.mrb[30].mxu0  ;;  %v1012_v4 = vpop.f32.mrb[30].mxu1 }
 0x128   : > { %v813_v1 = vadd.f32 %v2998_v59, %v812_v3  ;;  %v2485_v5 = vpop.f32.mrb[31].mxu0  ;;  %v1208_v6 = vmax.f32 %v1010_v0, 0.0  ;;  %v1013_v7 = vadd.f32 %v2998_v59, %v1012_v4  ;;  %v2585_v8 = vpop.f32.mrb[31].mxu1  ;;  %v1158_v9 = vmax.f32 %v810_v62, 0.0 }
 0x12a   : > { %v1159_v10 = vmax.f32 %v813_v1, 0.0  ;;  %v1209_v11 = vmax.f32 %v1013_v7, 0.0 }
 0x12c   : > { %v2135_v12 = vpack.c.bf16 %v1159_v10, %v1158_v9  ;;  %v2260_v13 = vpack.c.bf16 %v1209_v11, %v1208_v6 }
 0x12d   : > { %v817_v14 = vpop.f32.mrb[32].mxu0  ;;  %v1017_v15 = vpop.f32.mrb[32].mxu1 }
 0x12e   : > { %2348 = vst [vmem:[%s3009_s6 + $0x38] sm:$0xff] %v2135_v12   ;;  %2373 = vst [vmem:[%s3009_s6 + $0x100] sm:$0xff] %v2260_v13   ;;  %v818_v16 = vadd.f32 %v2998_v59, %v817_v14  ;;  %v2488_v17 = vpop.f32.mrb[33].mxu0  ;;  %v1018_v18 = vadd.f32 %v2998_v59, %v1017_v15  ;;  %v2588_v19 = vpop.f32.mrb[33].mxu1 }
 0x12f   : > { %v820_v20 = vpop.f32.mrb[34].mxu0  ;;  %v1020_v21 = vpop.f32.mrb[34].mxu1 }
 0x130   : > { %v821_v22 = vadd.f32 %v2998_v59, %v820_v20  ;;  %v2489_v23 = vpop.f32.mrb[35].mxu0  ;;  %v1210_v24 = vmax.f32 %v1018_v18, 0.0  ;;  %v1021_v25 = vadd.f32 %v2998_v59, %v1020_v21  ;;  %v2589_v26 = vpop.f32.mrb[35].mxu1  ;;  %v1160_v27 = vmax.f32 %v818_v16, 0.0 }
 0x132   : > { %v1161_v28 = vmax.f32 %v821_v22, 0.0  ;;  %v1211_v29 = vmax.f32 %v1021_v25, 0.0 }
 0x134   : > { %v2140_v30 = vpack.c.bf16 %v1161_v28, %v1160_v27  ;;  %v2265_v31 = vpack.c.bf16 %v1211_v29, %v1210_v24 }
 0x135   : > { %v825_v32 = vpop.f32.mrb[36].mxu0  ;;  %v1025_v33 = vpop.f32.mrb[36].mxu1 }
 0x136   : > { %2349 = vst [vmem:[%s3009_s6 + $0x40] sm:$0xff] %v2140_v30   ;;  %2374 = vst [vmem:[%s3009_s6 + $0x108] sm:$0xff] %v2265_v31   ;;  %v826_v34 = vadd.f32 %v2998_v59, %v825_v32  ;;  %v2492_v35 = vpop.f32.mrb[37].mxu0  ;;  %v1026_v36 = vadd.f32 %v2998_v59, %v1025_v33  ;;  %v2592_v37 = vpop.f32.mrb[37].mxu1 }
 0x137   : > { %v828_v38 = vpop.f32.mrb[38].mxu0  ;;  %v1028_v39 = vpop.f32.mrb[38].mxu1 }
 0x138   : > { %v829_v40 = vadd.f32 %v2998_v59, %v828_v38  ;;  %v2493_v41 = vpop.f32.mrb[39].mxu0  ;;  %v1212_v42 = vmax.f32 %v1026_v36, 0.0  ;;  %v1029_v43 = vadd.f32 %v2998_v59, %v1028_v39  ;;  %v2593_v44 = vpop.f32.mrb[39].mxu1  ;;  %v1162_v45 = vmax.f32 %v826_v34, 0.0 }
 0x13a   : > { %v1163_v46 = vmax.f32 %v829_v40, 0.0  ;;  %v1213_v47 = vmax.f32 %v1029_v43, 0.0 }
 0x13c   : > { %v2145_v48 = vpack.c.bf16 %v1163_v46, %v1162_v45  ;;  %v2270_v49 = vpack.c.bf16 %v1213_v47, %v1212_v42 }
 0x13d   : > { %v833_v50 = vpop.f32.mrb[40].mxu0  ;;  %v1033_v51 = vpop.f32.mrb[40].mxu1 }
 0x13e   : > { %2350 = vst [vmem:[%s3009_s6 + $0x48] sm:$0xff] %v2145_v48   ;;  %2375 = vst [vmem:[%s3009_s6 + $0x110] sm:$0xff] %v2270_v49   ;;  %v834_v52 = vadd.f32 %v2998_v59, %v833_v50  ;;  %v2496_v53 = vpop.f32.mrb[41].mxu0  ;;  %v1034_v54 = vadd.f32 %v2998_v59, %v1033_v51  ;;  %v2596_v55 = vpop.f32.mrb[41].mxu1 }
 0x13f   : > { %v836_v56 = vpop.f32.mrb[42].mxu0  ;;  %v1036_v57 = vpop.f32.mrb[42].mxu1 }
 0x140   : > { %v837_v58 = vadd.f32 %v2998_v59, %v836_v56  ;;  %v2497_v60 = vpop.f32.mrb[43].mxu0  ;;  %v1214_v61 = vmax.f32 %v1034_v54, 0.0  ;;  %v1037_v62 = vadd.f32 %v2998_v59, %v1036_v57  ;;  %v2597_v63 = vpop.f32.mrb[43].mxu1  ;;  %v1164_v0 = vmax.f32 %v834_v52, 0.0 }
 0x142   : > { %v1165_v2 = vmax.f32 %v837_v58, 0.0  ;;  %v1215_v3 = vmax.f32 %v1037_v62, 0.0 }
 0x144   : > { %v2150_v4 = vpack.c.bf16 %v1165_v2, %v1164_v0  ;;  %v2275_v1 = vpack.c.bf16 %v1215_v3, %v1214_v61 }
 0x145   : > { %v841_v5 = vpop.f32.mrb[44].mxu0  ;;  %v1041_v6 = vpop.f32.mrb[44].mxu1 }
 0x146   : > { %2351 = vst [vmem:[%s3009_s6 + $0x50] sm:$0xff] %v2150_v4   ;;  %2376 = vst [vmem:[%s3009_s6 + $0x118] sm:$0xff] %v2275_v1   ;;  %v842_v7 = vadd.f32 %v2998_v59, %v841_v5  ;;  %v2500_v8 = vpop.f32.mrb[45].mxu0  ;;  %v1042_v9 = vadd.f32 %v2998_v59, %v1041_v6  ;;  %v2600_v10 = vpop.f32.mrb[45].mxu1 }
 0x147   : > { %v844_v11 = vpop.f32.mrb[46].mxu0  ;;  %v1044_v12 = vpop.f32.mrb[46].mxu1 }
 0x148   : > { %v845_v13 = vadd.f32 %v2998_v59, %v844_v11  ;;  %v2501_v14 = vpop.f32.mrb[47].mxu0  ;;  %v1216_v15 = vmax.f32 %v1042_v9, 0.0  ;;  %v1045_v16 = vadd.f32 %v2998_v59, %v1044_v12  ;;  %v2601_v17 = vpop.f32.mrb[47].mxu1  ;;  %v1166_v18 = vmax.f32 %v842_v7, 0.0 }
 0x14a   : > { %v1167_v19 = vmax.f32 %v845_v13, 0.0  ;;  %v1217_v20 = vmax.f32 %v1045_v16, 0.0 }
 0x14c   : > { %v2155_v21 = vpack.c.bf16 %v1167_v19, %v1166_v18  ;;  %v2280_v22 = vpack.c.bf16 %v1217_v20, %v1216_v15 }
 0x14d   : > { %v849_v23 = vpop.f32.mrb[48].mxu0  ;;  %v1049_v24 = vpop.f32.mrb[48].mxu1 }
 0x14e   : > { %2352 = vst [vmem:[%s3009_s6 + $0x58] sm:$0xff] %v2155_v21   ;;  %2377 = vst [vmem:[%s3009_s6 + $0x120] sm:$0xff] %v2280_v22   ;;  %v850_v25 = vadd.f32 %v2998_v59, %v849_v23  ;;  %v2504_v26 = vpop.f32.mrb[49].mxu0  ;;  %v1050_v27 = vadd.f32 %v2998_v59, %v1049_v24  ;;  %v2604_v28 = vpop.f32.mrb[49].mxu1 }
 0x14f   : > { %v852_v29 = vpop.f32.mrb[50].mxu0  ;;  %v1052_v30 = vpop.f32.mrb[50].mxu1 }
 0x150   : > { %v853_v31 = vadd.f32 %v2998_v59, %v852_v29  ;;  %v2505_v32 = vpop.f32.mrb[51].mxu0  ;;  %v1218_v33 = vmax.f32 %v1050_v27, 0.0  ;;  %v1053_v34 = vadd.f32 %v2998_v59, %v1052_v30  ;;  %v2605_v35 = vpop.f32.mrb[51].mxu1  ;;  %v1168_v36 = vmax.f32 %v850_v25, 0.0 }
 0x152   : > { %v1169_v37 = vmax.f32 %v853_v31, 0.0  ;;  %v1219_v38 = vmax.f32 %v1053_v34, 0.0 }
 0x154   : > { %v2160_v39 = vpack.c.bf16 %v1169_v37, %v1168_v36  ;;  %v2285_v40 = vpack.c.bf16 %v1219_v38, %v1218_v33 }
 0x155   : > { %v857_v41 = vpop.f32.mrb[52].mxu0  ;;  %v1057_v42 = vpop.f32.mrb[52].mxu1 }
 0x156   : > { %2353 = vst [vmem:[%s3009_s6 + $0x60] sm:$0xff] %v2160_v39   ;;  %2378 = vst [vmem:[%s3009_s6 + $0x128] sm:$0xff] %v2285_v40   ;;  %v858_v43 = vadd.f32 %v2998_v59, %v857_v41  ;;  %v2508_v44 = vpop.f32.mrb[53].mxu0  ;;  %v1058_v45 = vadd.f32 %v2998_v59, %v1057_v42  ;;  %v2608_v46 = vpop.f32.mrb[53].mxu1 }
 0x157   : > { %v860_v47 = vpop.f32.mrb[54].mxu0  ;;  %v1060_v48 = vpop.f32.mrb[54].mxu1 }
 0x158   : > { %v861_v49 = vadd.f32 %v2998_v59, %v860_v47  ;;  %v2509_v50 = vpop.f32.mrb[55].mxu0  ;;  %v1220_v51 = vmax.f32 %v1058_v45, 0.0  ;;  %v1061_v52 = vadd.f32 %v2998_v59, %v1060_v48  ;;  %v2609_v53 = vpop.f32.mrb[55].mxu1  ;;  %v1170_v54 = vmax.f32 %v858_v43, 0.0 }
 0x15a   : > { %v1171_v55 = vmax.f32 %v861_v49, 0.0  ;;  %v1221_v56 = vmax.f32 %v1061_v52, 0.0 }
 0x15c   : > { %v2165_v57 = vpack.c.bf16 %v1171_v55, %v1170_v54  ;;  %v2290_v58 = vpack.c.bf16 %v1221_v56, %v1220_v51 }
 0x15d   : > { %v865_v60 = vpop.f32.mrb[56].mxu0  ;;  %v1065_v61 = vpop.f32.mrb[56].mxu1 }
 0x15e   : > { %2354 = vst [vmem:[%s3009_s6 + $0x68] sm:$0xff] %v2165_v57   ;;  %2379 = vst [vmem:[%s3009_s6 + $0x130] sm:$0xff] %v2290_v58   ;;  %v866_v62 = vadd.f32 %v2998_v59, %v865_v60  ;;  %v2512_v63 = vpop.f32.mrb[57].mxu0  ;;  %v1066_v0 = vadd.f32 %v2998_v59, %v1065_v61  ;;  %v2612_v2 = vpop.f32.mrb[57].mxu1 }
 0x15f   : > { %v868_v3 = vpop.f32.mrb[58].mxu0  ;;  %v1068_v4 = vpop.f32.mrb[58].mxu1 }
 0x160   : > { %v869_v1 = vadd.f32 %v2998_v59, %v868_v3  ;;  %v2513_v5 = vpop.f32.mrb[59].mxu0  ;;  %v1222_v6 = vmax.f32 %v1066_v0, 0.0  ;;  %v1069_v7 = vadd.f32 %v2998_v59, %v1068_v4  ;;  %v2613_v8 = vpop.f32.mrb[59].mxu1  ;;  %v1172_v9 = vmax.f32 %v866_v62, 0.0 }
 0x162   : > { %v1173_v10 = vmax.f32 %v869_v1, 0.0  ;;  %v1223_v11 = vmax.f32 %v1069_v7, 0.0 }
 0x164   : > { %v2170_v12 = vpack.c.bf16 %v1173_v10, %v1172_v9  ;;  %v2295_v13 = vpack.c.bf16 %v1223_v11, %v1222_v6 }
 0x165   : > { %v873_v14 = vpop.f32.mrb[60].mxu0  ;;  %v1073_v15 = vpop.f32.mrb[60].mxu1 }
 0x166   : > { %2355 = vst [vmem:[%s3009_s6 + $0x70] sm:$0xff] %v2170_v12   ;;  %2380 = vst [vmem:[%s3009_s6 + $0x138] sm:$0xff] %v2295_v13   ;;  %v874_v16 = vadd.f32 %v2998_v59, %v873_v14  ;;  %v2516_v17 = vpop.f32.mrb[61].mxu0  ;;  %v1074_v18 = vadd.f32 %v2998_v59, %v1073_v15  ;;  %v2616_v19 = vpop.f32.mrb[61].mxu1 }
 0x167   : > { %v876_v20 = vpop.f32.mrb[62].mxu0  ;;  %v1076_v21 = vpop.f32.mrb[62].mxu1 }
 0x168   : > { %v877_v22 = vadd.f32 %v2998_v59, %v876_v20  ;;  %v2517_v23 = vpop.f32.mrb[63].mxu0  ;;  %v1224_v24 = vmax.f32 %v1074_v18, 0.0  ;;  %v1077_v25 = vadd.f32 %v2998_v59, %v1076_v21  ;;  %v2617_v26 = vpop.f32.mrb[63].mxu1  ;;  %v1174_v27 = vmax.f32 %v874_v16, 0.0 }
 0x16a   : > { %v1175_v28 = vmax.f32 %v877_v22, 0.0  ;;  %v1225_v29 = vmax.f32 %v1077_v25, 0.0 }
 0x16c   : > { %v2175_v30 = vpack.c.bf16 %v1175_v28, %v1174_v27  ;;  %v2300_v31 = vpack.c.bf16 %v1225_v29, %v1224_v24 }
 0x16d   : > { %v881_v32 = vpop.f32.mrb[64].mxu0  ;;  %v1081_v33 = vpop.f32.mrb[64].mxu1 }
 0x16e   : > { %2356 = vst [vmem:[%s3009_s6 + $0x78] sm:$0xff] %v2175_v30   ;;  %2381 = vst [vmem:[%s3009_s6 + $0x140] sm:$0xff] %v2300_v31   ;;  %v882_v34 = vadd.f32 %v2998_v59, %v881_v32  ;;  %v2520_v35 = vpop.f32.mrb[65].mxu0  ;;  %v1082_v36 = vadd.f32 %v2998_v59, %v1081_v33  ;;  %v2620_v37 = vpop.f32.mrb[65].mxu1 }
 0x16f   : > { %v884_v38 = vpop.f32.mrb[66].mxu0  ;;  %v1084_v39 = vpop.f32.mrb[66].mxu1 }
 0x170   : > { %v885_v40 = vadd.f32 %v2998_v59, %v884_v38  ;;  %v2521_v41 = vpop.f32.mrb[67].mxu0  ;;  %v1226_v42 = vmax.f32 %v1082_v36, 0.0  ;;  %v1085_v43 = vadd.f32 %v2998_v59, %v1084_v39  ;;  %v2621_v44 = vpop.f32.mrb[67].mxu1  ;;  %v1176_v45 = vmax.f32 %v882_v34, 0.0 }
 0x172   : > { %v1177_v46 = vmax.f32 %v885_v40, 0.0  ;;  %v1227_v47 = vmax.f32 %v1085_v43, 0.0 }
 0x174   : > { %v2180_v48 = vpack.c.bf16 %v1177_v46, %v1176_v45  ;;  %v2305_v49 = vpack.c.bf16 %v1227_v47, %v1226_v42 }
 0x175   : > { %v889_v50 = vpop.f32.mrb[68].mxu0  ;;  %v1089_v51 = vpop.f32.mrb[68].mxu1 }
 0x176   : > { %2357 = vst [vmem:[%s3009_s6 + $0x80] sm:$0xff] %v2180_v48   ;;  %2382 = vst [vmem:[%s3009_s6 + $0x148] sm:$0xff] %v2305_v49   ;;  %v890_v52 = vadd.f32 %v2998_v59, %v889_v50  ;;  %v2524_v53 = vpop.f32.mrb[69].mxu0  ;;  %v1090_v54 = vadd.f32 %v2998_v59, %v1089_v51  ;;  %v2624_v55 = vpop.f32.mrb[69].mxu1 }
 0x177   : > { %v892_v56 = vpop.f32.mrb[70].mxu0  ;;  %v1092_v57 = vpop.f32.mrb[70].mxu1 }
 0x178   : > { %v893_v58 = vadd.f32 %v2998_v59, %v892_v56  ;;  %v2525_v60 = vpop.f32.mrb[71].mxu0  ;;  %v1228_v61 = vmax.f32 %v1090_v54, 0.0  ;;  %v1093_v62 = vadd.f32 %v2998_v59, %v1092_v57  ;;  %v2625_v63 = vpop.f32.mrb[71].mxu1  ;;  %v1178_v0 = vmax.f32 %v890_v52, 0.0 }
 0x17a   : > { %v1179_v2 = vmax.f32 %v893_v58, 0.0  ;;  %v1229_v3 = vmax.f32 %v1093_v62, 0.0 }
 0x17c   : > { %v2185_v4 = vpack.c.bf16 %v1179_v2, %v1178_v0  ;;  %v2310_v1 = vpack.c.bf16 %v1229_v3, %v1228_v61 }
 0x17d   : > { %v897_v5 = vpop.f32.mrb[72].mxu0  ;;  %v1097_v6 = vpop.f32.mrb[72].mxu1 }
 0x17e   : > { %2358 = vst [vmem:[%s3009_s6 + $0x88] sm:$0xff] %v2185_v4   ;;  %2383 = vst [vmem:[%s3009_s6 + $0x150] sm:$0xff] %v2310_v1   ;;  %v898_v7 = vadd.f32 %v2998_v59, %v897_v5  ;;  %v2528_v8 = vpop.f32.mrb[73].mxu0  ;;  %v1098_v9 = vadd.f32 %v2998_v59, %v1097_v6  ;;  %v2628_v10 = vpop.f32.mrb[73].mxu1 }
 0x17f   : > { %v900_v11 = vpop.f32.mrb[74].mxu0  ;;  %v1100_v12 = vpop.f32.mrb[74].mxu1 }
 0x180   : > { %v901_v13 = vadd.f32 %v2998_v59, %v900_v11  ;;  %v2529_v14 = vpop.f32.mrb[75].mxu0  ;;  %v1230_v15 = vmax.f32 %v1098_v9, 0.0  ;;  %v1101_v16 = vadd.f32 %v2998_v59, %v1100_v12  ;;  %v2629_v17 = vpop.f32.mrb[75].mxu1  ;;  %v1180_v18 = vmax.f32 %v898_v7, 0.0 }
 0x182   : > { %v1181_v19 = vmax.f32 %v901_v13, 0.0  ;;  %v1231_v20 = vmax.f32 %v1101_v16, 0.0 }
 0x184   : > { %v2190_v21 = vpack.c.bf16 %v1181_v19, %v1180_v18  ;;  %v2315_v22 = vpack.c.bf16 %v1231_v20, %v1230_v15 }
 0x185   : > { %v905_v23 = vpop.f32.mrb[76].mxu0  ;;  %v1105_v24 = vpop.f32.mrb[76].mxu1 }
 0x186   : > { %2359 = vst [vmem:[%s3009_s6 + $0x90] sm:$0xff] %v2190_v21   ;;  %2384 = vst [vmem:[%s3009_s6 + $0x158] sm:$0xff] %v2315_v22   ;;  %v906_v25 = vadd.f32 %v2998_v59, %v905_v23  ;;  %v2532_v26 = vpop.f32.mrb[77].mxu0  ;;  %v1106_v27 = vadd.f32 %v2998_v59, %v1105_v24  ;;  %v2632_v28 = vpop.f32.mrb[77].mxu1 }
 0x187   : > { %v908_v29 = vpop.f32.mrb[78].mxu0  ;;  %v1108_v30 = vpop.f32.mrb[78].mxu1 }
 0x188   : > { %v909_v31 = vadd.f32 %v2998_v59, %v908_v29  ;;  %v2533_v32 = vpop.f32.mrb[79].mxu0  ;;  %v1232_v33 = vmax.f32 %v1106_v27, 0.0  ;;  %v1109_v34 = vadd.f32 %v2998_v59, %v1108_v30  ;;  %v2633_v35 = vpop.f32.mrb[79].mxu1  ;;  %v1182_v36 = vmax.f32 %v906_v25, 0.0 }
 0x18a   : > { %v1183_v37 = vmax.f32 %v909_v31, 0.0  ;;  %v1233_v38 = vmax.f32 %v1109_v34, 0.0 }
 0x18c   : > { %v2195_v39 = vpack.c.bf16 %v1183_v37, %v1182_v36  ;;  %v2320_v40 = vpack.c.bf16 %v1233_v38, %v1232_v33 }
 0x18d   : > { %v913_v41 = vpop.f32.mrb[80].mxu0  ;;  %v1113_v42 = vpop.f32.mrb[80].mxu1 }
 0x18e   : > { %2360 = vst [vmem:[%s3009_s6 + $0x98] sm:$0xff] %v2195_v39   ;;  %2385 = vst [vmem:[%s3009_s6 + $0x160] sm:$0xff] %v2320_v40   ;;  %v914_v43 = vadd.f32 %v2998_v59, %v913_v41  ;;  %v2536_v44 = vpop.f32.mrb[81].mxu0  ;;  %v1114_v45 = vadd.f32 %v2998_v59, %v1113_v42  ;;  %v2636_v46 = vpop.f32.mrb[81].mxu1 }
 0x18f   : > { %v916_v47 = vpop.f32.mrb[82].mxu0  ;;  %v1116_v48 = vpop.f32.mrb[82].mxu1 }
 0x190   : > { %v917_v49 = vadd.f32 %v2998_v59, %v916_v47  ;;  %v2537_v50 = vpop.f32.mrb[83].mxu0  ;;  %v1234_v51 = vmax.f32 %v1114_v45, 0.0  ;;  %v1117_v52 = vadd.f32 %v2998_v59, %v1116_v48  ;;  %v2637_v53 = vpop.f32.mrb[83].mxu1  ;;  %v1184_v54 = vmax.f32 %v914_v43, 0.0 }
 0x192   : > { %v1185_v55 = vmax.f32 %v917_v49, 0.0  ;;  %v1235_v56 = vmax.f32 %v1117_v52, 0.0 }
 0x194   : > { %v2200_v57 = vpack.c.bf16 %v1185_v55, %v1184_v54  ;;  %v2325_v58 = vpack.c.bf16 %v1235_v56, %v1234_v51 }
 0x195   : > { %v921_v60 = vpop.f32.mrb[84].mxu0  ;;  %v1121_v61 = vpop.f32.mrb[84].mxu1 }
 0x196   : > { %2361 = vst [vmem:[%s3009_s6 + $0xa0] sm:$0xff] %v2200_v57   ;;  %2386 = vst [vmem:[%s3009_s6 + $0x168] sm:$0xff] %v2325_v58   ;;  %v922_v62 = vadd.f32 %v2998_v59, %v921_v60  ;;  %v2540_v63 = vpop.f32.mrb[85].mxu0  ;;  %v1122_v0 = vadd.f32 %v2998_v59, %v1121_v61  ;;  %v2640_v2 = vpop.f32.mrb[85].mxu1 }
 0x197   : > { %v924_v3 = vpop.f32.mrb[86].mxu0  ;;  %v1124_v4 = vpop.f32.mrb[86].mxu1 }
 0x198   : > { %v925_v1 = vadd.f32 %v2998_v59, %v924_v3  ;;  %v2541_v5 = vpop.f32.mrb[87].mxu0  ;;  %v1236_v6 = vmax.f32 %v1122_v0, 0.0  ;;  %v1125_v7 = vadd.f32 %v2998_v59, %v1124_v4  ;;  %v2641_v8 = vpop.f32.mrb[87].mxu1  ;;  %v1186_v9 = vmax.f32 %v922_v62, 0.0 }
 0x19a   : > { %v1187_v10 = vmax.f32 %v925_v1, 0.0  ;;  %v1237_v11 = vmax.f32 %v1125_v7, 0.0 }
 0x19c   : > { %v2205_v12 = vpack.c.bf16 %v1187_v10, %v1186_v9  ;;  %v2330_v13 = vpack.c.bf16 %v1237_v11, %v1236_v6 }
 0x19d   : > { %v929_v14 = vpop.f32.mrb[88].mxu0  ;;  %v1129_v15 = vpop.f32.mrb[88].mxu1 }
 0x19e   : > { %2362 = vst [vmem:[%s3009_s6 + $0xa8] sm:$0xff] %v2205_v12   ;;  %2387 = vst [vmem:[%s3009_s6 + $0x170] sm:$0xff] %v2330_v13   ;;  %v930_v16 = vadd.f32 %v2998_v59, %v929_v14  ;;  %v2544_v17 = vpop.f32.mrb[89].mxu0  ;;  %v1130_v18 = vadd.f32 %v2998_v59, %v1129_v15  ;;  %v2644_v19 = vpop.f32.mrb[89].mxu1 }
 0x19f   : > { %v932_v20 = vpop.f32.mrb[90].mxu0  ;;  %v1132_v21 = vpop.f32.mrb[90].mxu1 }
 0x1a0   : > { %v933_v22 = vadd.f32 %v2998_v59, %v932_v20  ;;  %v2545_v23 = vpop.f32.mrb[91].mxu0  ;;  %v1238_v24 = vmax.f32 %v1130_v18, 0.0  ;;  %v1133_v25 = vadd.f32 %v2998_v59, %v1132_v21  ;;  %v2645_v26 = vpop.f32.mrb[91].mxu1  ;;  %v1188_v27 = vmax.f32 %v930_v16, 0.0 }
 0x1a2   : > { %v1189_v28 = vmax.f32 %v933_v22, 0.0  ;;  %v1239_v29 = vmax.f32 %v1133_v25, 0.0 }
 0x1a4   : > { %v2210_v30 = vpack.c.bf16 %v1189_v28, %v1188_v27  ;;  %v2335_v31 = vpack.c.bf16 %v1239_v29, %v1238_v24 }
 0x1a5   : > { %v937_v32 = vpop.f32.mrb[92].mxu0  ;;  %v1137_v33 = vpop.f32.mrb[92].mxu1 }
 0x1a6   : > { %2363 = vst [vmem:[%s3009_s6 + $0xb0] sm:$0xff] %v2210_v30   ;;  %2388 = vst [vmem:[%s3009_s6 + $0x178] sm:$0xff] %v2335_v31   ;;  %v938_v34 = vadd.f32 %v2998_v59, %v937_v32  ;;  %v2548_v35 = vpop.f32.mrb[93].mxu0  ;;  %v1138_v36 = vadd.f32 %v2998_v59, %v1137_v33  ;;  %v2648_v37 = vpop.f32.mrb[93].mxu1 }
 0x1a7   : > { %v940_v38 = vpop.f32.mrb[94].mxu0  ;;  %v1140_v39 = vpop.f32.mrb[94].mxu1 }
 0x1a8   : > { %v941_v40 = vadd.f32 %v2998_v59, %v940_v38  ;;  %v2549_v41 = vpop.f32.mrb[95].mxu0  ;;  %v1240_v42 = vmax.f32 %v1138_v36, 0.0  ;;  %v1141_v43 = vadd.f32 %v2998_v59, %v1140_v39  ;;  %v2649_v44 = vpop.f32.mrb[95].mxu1  ;;  %v1190_v45 = vmax.f32 %v938_v34, 0.0 }
 0x1aa   : > { %v1191_v46 = vmax.f32 %v941_v40, 0.0  ;;  %v1241_v47 = vmax.f32 %v1141_v43, 0.0 }
 0x1ac   : > { %v2215_v48 = vpack.c.bf16 %v1191_v46, %v1190_v45  ;;  %v2340_v49 = vpack.c.bf16 %v1241_v47, %v1240_v42 }
 0x1ad   : > { %v945_v50 = vpop.f32.mrb[96].mxu0 }
 0x1ae   : > { %2364 = vst [vmem:[%s3009_s6 + $0xb8] sm:$0xff] %v2215_v48   ;;  %2389 = vst [vmem:[%s3009_s6 + $0x180] sm:$0xff] %v2340_v49   ;;  %v946_v51 = vadd.f32 %v2998_v59, %v945_v50  ;;  %v2552_v52 = vpop.f32.mrb[97].mxu0 }
 0x1af   : > { %v948_v53 = vpop.f32.mrb[98].mxu0 }
 0x1b0   : > { %v949_v54 = vadd.f32 %v2998_v59, %v948_v53  ;;  %v2553_v55 = vpop.f32.mrb[99].mxu0  ;;  %v1192_v56 = vmax.f32 %v946_v51, 0.0 }
 0x1b2   : > { %v1193_v57 = vmax.f32 %v949_v54, 0.0 }
 0x1b4   : > { %v2220_v58 = vpack.c.bf16 %v1193_v57, %v1192_v56 }
 0x1b6   : > { %2365 = vst [vmem:[%s3009_s6 + $0xc0] sm:$0xff] %v2220_v58  }
 0x1b7 PF: > { %s13_s12 = sadd.s32 1, %s2731_s12  }
 0x1b8   : > { %p10_p4 = scmp.ge.s32.totalorder %s13_s12, 4  }
 0x1ba   :  { %12 = sbr.rel (!%p10_p4) target bundleno = 1 (0x1), region = 62 }

// kernel: net_forward.4
= control target key start
LH: loop header
LB: loop body
LE: loop exit
PB: predicated region body
PF: predicated region fallthrough
CT: control target
= control target key end

     0   :  { %s575_s12 = smov 0   ;;  %s639_s0 = inlined_call_operand.vmem [shape: bf16[200,150], index: 0, kind: input, shape index: {}]   ;;  %s640_s1 = inlined_call_operand.vmem [shape: bf16[150,128], index: 1, kind: input, shape index: {}]   ;;  %s641_s2 = inlined_call_operand.vmem [shape: f32[1,128], index: 2, kind: input, shape index: {}]   ;;  %s642_s3 = inlined_call_operand.vmem [shape: bf16[200,128], index: 3, kind: output, shape index: {}]  }
   0x1 LB: > { %s447_s13 = sadd.s32 4294967295, %s552_s12   ;;  %p451_p0 = scmp.ge.s32.totalorder %s552_s12, 1  ;;  %s552_s12 = sphi %s575_s12, %s13_s12  }
   0x2   : > { %p139_p1 = scmp.lt.s32.totalorder %s552_s12, 6 }
   0x4   : > { %p140_p2 = pnand %p451_p0, %p139_p1 }
   0x5   : > { %v528_v0 = vld [vmem:[%s640_s1] sm:$0xff] (!%p140_p2)   ;;  %v554_v1 = vmov (!%p140_p2), 0   ;;  %v529_v2 = vld [vmem:[%s640_s1 + $0x8] sm:$0xff] (!%p140_p2)   ;;  %s164_s18 = smul.u32 (!%p140_p2), 5, %s447_s13  ;;  %v530_v3 = vld [vmem:[%s640_s1 + $0x10] sm:$0xff] (!%p140_p2)   ;;  %vm290_vm0 = vcmask (!%p140_p2), 179200  }
   0x6   : > { %143 = sbr.rel (%p140_p2) target bundleno = 273 (0x111), region = 32  ;;  %499 = vmatprep.subr.bf16.mxu1 (!%p140_p2), %v554_v1  ;;  %304 = vmatprep.subr.bf16.mxu0 (!%p140_p2), %v554_v1  ;;  %v531_v4 = vld [vmem:[%s640_s1 + $0x18] sm:$0xff] (!%p140_p2)   ;;  %v532_v7 = vld [vmem:[%s640_s1 + $0x20] sm:$0xff] (!%p140_p2)   ;;  %v533_v8 = vld [vmem:[%s640_s1 + $0x28] sm:$0xff] (!%p140_p2)   ;;  %vm300_vm1 = vcmask (!%p140_p2), 1042432  }
   0x7   : > { %509 = vmatpush1.bf16.msra.mxu1 (!%p140_p2), %v528_v0  ;;  %305 = vmatpush1.bf16.msra.mxu0 (!%p140_p2), %v528_v0  ;;  %p165_p3 = scmp.lt.s32.totalorder (!%p140_p2), %s164_s18, 24  ;;  %v534_v9 = vld [vmem:[%s640_s1 + $0x30] sm:$0xff] (!%p140_p2)   ;;  %v535_v10 = vld [vmem:[%s640_s1 + $0x38] sm:$0xff] (!%p140_p2)   ;;  %v536_v11 = vld [vmem:[%s640_s1 + $0x40] sm:$0xff] (!%p140_p2)  }
   0x8   : > { %500 = vmatprep.subr.bf16.mxu1 (!%p140_p2), %v554_v1  ;;  %306 = vmatprep.subr.bf16.mxu0 (!%p140_p2), %v554_v1  ;;  %v537_v12 = vld [vmem:[%s640_s1 + $0x48] ss:$0 sps:$4 sm:$0x77] (!%p140_p2)   ;;  %v455_v19 = vld [vmem:[%s641_s2] ss:$0 sm:$0xff] (!%p140_p2) }
   0x9   : > { %v302_v13 = vsel (!%p140_p2), %vm300_vm1, %v537_v12, 0 }
   0xb   : > { %510 = vmatpush1.bf16.msra.mxu1 (!%p140_p2), %v529_v2  ;;  %307 = vmatpush1.bf16.msra.mxu0 (!%p140_p2), %v529_v2 }
   0xc   : > { %501 = vmatprep.subr.bf16.mxu1 (!%p140_p2), %v554_v1  ;;  %308 = vmatprep.subr.bf16.mxu0 (!%p140_p2), %v554_v1 }
   0xd   : > { %s644_s18 = smov (!%p165_p3, %s164_s18), 24 }
   0xe   : > { %s482_s21 = sshll.u32 %s644_s18, 3  ;;  %s454_s15 = sshll.u32 %s644_s18, 2 }
   0xf   : > { %s598_s24 = scalar_lea.vmem %s639_s0, %s482_s21  ;;  %511 = vmatpush1.bf16.msra.mxu1 %v530_v3  ;;  %309 = vmatpush1.bf16.msra.mxu0 %v530_v3  ;;  %s175_s19 = scalar_lea.vmem %s642_s3, %s454_s15 }
  0x10   : > { %502 = vmatprep.subr.bf16.mxu1 %v554_v1  ;;  %310 = vmatprep.subr.bf16.mxu0 %v554_v1  ;;  %v540_v5 = vld [vmem:[%s598_s24 + $0x14] ss:$8 sps:$4 sm:$0xff]   ;;  %v543_v6 = vld [vmem:[%s598_s24 + $0x4] ss:$8 sps:$4 sm:$0xff]   ;;  %v538_v15 = vld [vmem:[%s598_s24 + $0x10] ss:$8 sps:$4 sm:$0xff]  }
  0x11   : > { %473 = vmatprep.mubr.msk.bf16.mxu1 %vm290_vm0, %v540_v5  ;;  %472 = vmatprep.mubr.msk.bf16.mxu0 %vm290_vm0, %v543_v6  ;;  %v182_v14 = vld [vmem:[%s598_s24 + $0x20] sm:$0xff] }
  0x12   : > { %v541_v16 = vld [vmem:[%s598_s24] ss:$8 sps:$4 sm:$0xff]   ;;  %v461_v17 = vcombine.high %v182_v14, %v182_v14  ;;  %v460_v18 = vcombine.low %v182_v14, %v182_v14 }
  0x13   : > { %512 = vmatpush1.bf16.msra.mxu1 %v531_v4  ;;  %311 = vmatpush1.bf16.msra.mxu0 %v531_v4 }
  0x14   : > { %503 = vmatprep.subr.bf16.mxu1 %v554_v1  ;;  %312 = vmatprep.subr.bf16.mxu0 %v554_v1 }
  0x17   : > { %513 = vmatpush1.bf16.msra.mxu1 %v532_v7  ;;  %313 = vmatpush1.bf16.msra.mxu0 %v532_v7 }
  0x18   : > { %504 = vmatprep.subr.bf16.mxu1 %v554_v1  ;;  %314 = vmatprep.subr.bf16.mxu0 %v554_v1 }
  0x1b   : > { %514 = vmatpush1.bf16.msra.mxu1 %v533_v8  ;;  %315 = vmatpush1.bf16.msra.mxu0 %v533_v8 }
  0x1c   : > { %505 = vmatprep.subr.bf16.mxu1 %v554_v1  ;;  %316 = vmatprep.subr.bf16.mxu0 %v554_v1 }
  0x1f   : > { %515 = vmatpush1.bf16.msra.mxu1 %v534_v9  ;;  %317 = vmatpush1.bf16.msra.mxu0 %v534_v9 }
  0x20   : > { %506 = vmatprep.subr.bf16.mxu1 %v554_v1  ;;  %318 = vmatprep.subr.bf16.mxu0 %v554_v1 }
  0x23   : > { %516 = vmatpush1.bf16.msra.mxu1 %v535_v10  ;;  %319 = vmatpush1.bf16.msra.mxu0 %v535_v10 }
  0x24   : > { %507 = vmatprep.subr.bf16.mxu1 %v554_v1  ;;  %320 = vmatprep.subr.bf16.mxu0 %v554_v1 }
  0x27   : > { %517 = vmatpush1.bf16.msra.mxu1 %v536_v11  ;;  %321 = vmatpush1.bf16.msra.mxu0 %v536_v11 }
  0x28   : > { %508 = vmatprep.subr.bf16.mxu1 %v554_v1  ;;  %322 = vmatprep.subr.bf16.mxu0 %v554_v1 }
  0x2b   : > { %518 = vmatpush1.bf16.msra.mxu1 %v302_v13  ;;  %323 = vmatpush1.bf16.msra.mxu0 %v302_v13 }
  0x2e   : > { %345 = vmatmul.mubr.bf16.vlgmr.msra.gmra.mrb[0].mxu1 %v538_v15  ;;  %337 = vmatmul.mubr.bf16.vlgmr.msra.gmra.mrb[0].mxu0 %v541_v16 }
  0x2f   : > { %474 = vmatprep.mubr.msk.bf16.mxu1 %vm290_vm0, %v461_v17 }
  0x36   : > { %353 = vmatmul.mubr.bf16.gmra.mrb[4].mxu1 %v460_v18 }
 0x101   : > { %v346_v20 = vpop.f32.mrb[0].mxu1  ;;  %v338_v21 = vpop.f32.mrb[0].mxu0 }
 0x102   : > { %v347_v22 = vadd.f32 %v455_v19, %v346_v20  ;;  %v348_v23 = vpop.f32.mrb[1].mxu1  ;;  %v339_v24 = vadd.f32 %v455_v19, %v338_v21  ;;  %v340_v25 = vpop.f32.mrb[1].mxu0 }
 0x103   : > { %v349_v26 = vpop.f32.mrb[2].mxu1  ;;  %v341_v27 = vpop.f32.mrb[2].mxu0 }
 0x104   : > { %v350_v28 = vadd.f32 %v455_v19, %v349_v26  ;;  %v360_v29 = vmax.f32 %v339_v24, 0.0  ;;  %v351_v30 = vpop.f32.mrb[3].mxu1  ;;  %v342_v31 = vadd.f32 %v455_v19, %v341_v27  ;;  %v343_v32 = vpop.f32.mrb[3].mxu0  ;;  %v362_v33 = vmax.f32 %v347_v22, 0.0 }
 0x106   : > { %v363_v34 = vmax.f32 %v350_v28, 0.0  ;;  %v361_v35 = vmax.f32 %v342_v31, 0.0 }
 0x108   : > { %v496_v36 = vpack.c.bf16 %v363_v34, %v362_v33  ;;  %v491_v37 = vpack.c.bf16 %v361_v35, %v360_v29 }
 0x109   : > { %v354_v38 = vpop.f32.mrb[4].mxu1 }
 0x10a   : > { %498 = vst [vmem:[%s175_s19 + $0x8] sm:$0xff] %v496_v36   ;;  %492 = vst [vmem:[%s175_s19] sm:$0xff] %v491_v37   ;;  %v355_v39 = vadd.f32 %v455_v19, %v354_v38  ;;  %v356_v40 = vpop.f32.mrb[5].mxu1 }
 0x10b   : > { %v357_v41 = vpop.f32.mrb[6].mxu1 }
 0x10c   : > { %v364_v42 = vmax.f32 %v355_v39, 0.0  ;;  %v358_v43 = vpop.f32.mrb[7].mxu1 }
 0x10e   : > { %v487_v44 = vpack.c.bf16 %v364_v42, %v364_v42 }
 0x110   : > { %390 = vst [vmem:[%s175_s19 + $0x10] sm:$0xf] %v487_v44 }
 0x111 PF: > { %s13_s12 = sadd.s32 1, %s552_s12  }
 0x112   : > { %p10_p4 = scmp.ge.s32.totalorder %s13_s12, 7  }
 0x114   :  { %12 = sbr.rel (!%p10_p4) target bundleno = 1 (0x1), region = 62 }

// kernel: net_forward.5
= control target key start
LH: loop header
LB: loop body
LE: loop exit
PB: predicated region body
PF: predicated region fallthrough
CT: control target
= control target key end

     0   :  { %v785_v1 = vmov 0   ;;  %v98_v20 = vlaneseq  ;;  %v786_v25 = vmov 1966171168   ;;  %vm264_vm0 = vcmask 130048   ;;  %s1004_s0 = inlined_call_operand.vmem [shape: bf16[2,400], index: 0, kind: input, shape index: {}]   ;;  %s1005_s1 = inlined_call_operand.vmem [shape: bf16[400,128], index: 1, kind: input, shape index: {}]   ;;  %s1006_s2 = inlined_call_operand.vmem [shape: f32[1,128], index: 2, kind: input, shape index: {}]   ;;  %s1007_s3 = inlined_call_operand.vmem [shape: bf16[128,128], index: 3, kind: input, shape index: {}]   ;;  %s1008_s4 = inlined_call_operand.vmem [shape: f32[1,128], index: 4, kind: input, shape index: {}]   ;;  %s1009_s5 = inlined_call_operand.vmem [shape: bf16[128,128], index: 5, kind: input, shape index: {}]   ;;  %s1010_s6 = inlined_call_operand.vmem [shape: f32[1,128], index: 6, kind: input, shape index: {}]   ;;  %s1011_s7 = inlined_call_operand.hbm [shape: f32[2,128], index: 7, kind: output, shape index: {}]  }
   0x1   :  { %v720_v0 = vld [vmem:[%s1005_s1 + $0x40] sm:$0xff]   ;;  %308 = vmatprep.subr.bf16.mxu1 %v785_v1  ;;  %v723_v4 = vld [vmem:[%s1005_s1 + $0x48] sm:$0xff]   ;;  %v726_v7 = vld [vmem:[%s1005_s1 + $0x50] sm:$0xff]   ;;  %v96_v26 = vunpack.c.l.s4 %v786_v25  ;;  %v787_v38 = vmov 0.0  }
   0x2   :  { %v721_v2 = vld [vmem:[%s1005_s1 + $0x80] sm:$0xff]   ;;  %635 = vmatprep.subr.bf16.mxu0 %v720_v0  ;;  %v724_v5 = vld [vmem:[%s1005_s1 + $0x88] sm:$0xff]   ;;  %v727_v8 = vld [vmem:[%s1005_s1 + $0x90] sm:$0xff]   ;;  %v99_v27 = vshrl.u32 %v98_v20, 7 }
   0x3   :  { %v722_v3 = vld [vmem:[%s1005_s1] sm:$0xff]   ;;  %309 = vmatpush1.bf16.msra.mxu1 %v721_v2  ;;  %v725_v6 = vld [vmem:[%s1005_s1 + $0x8] sm:$0xff]   ;;  %v728_v9 = vld [vmem:[%s1005_s1 + $0x10] sm:$0xff]   ;;  %v97_v30 = vunpack.c.0.s8 %v96_v26 }
   0x4   :  { %636 = vmatpush3.bf16.msra.mxu0 %v722_v3  ;;  %310 = vmatprep.subr.bf16.mxu1 %v785_v1  ;;  %v729_v10 = vld [vmem:[%s1005_s1 + $0x58] sm:$0xff]   ;;  %v732_v13 = vld [vmem:[%s1005_s1 + $0x60] sm:$0xff]   ;;  %v735_v16 = vld [vmem:[%s1005_s1 + $0x68] sm:$0xff]  }
   0x5   :  { %637 = vmatprep.subr.bf16.mxu0 %v723_v4  ;;  %v730_v11 = vld [vmem:[%s1005_s1 + $0x98] sm:$0xff]   ;;  %v733_v14 = vld [vmem:[%s1005_s1 + $0xa0] sm:$0xff]   ;;  %v736_v17 = vld [vmem:[%s1005_s1 + $0xa8] sm:$0xff]   ;;  %v100_v32 = vsub.s32 %v97_v30, %v99_v27 }
   0x6   :  { %v731_v12 = vld [vmem:[%s1005_s1 + $0x18] sm:$0xff]   ;;  %v734_v15 = vld [vmem:[%s1005_s1 + $0x20] sm:$0xff]   ;;  %v737_v18 = vld [vmem:[%s1005_s1 + $0x28] sm:$0xff]  }
   0x7   :  { %311 = vmatpush1.bf16.msra.mxu1 %v724_v5  ;;  %v738_v19 = vld [vmem:[%s1005_s1 + $0x70] sm:$0xff]   ;;  %v590_v23 = vld.sshfl [vmem:[%s1004_s0] sm:$0x33 pattern:$0x75316420]  ;;  %v741_v24 = vld [vmem:[%s1005_s1 + $0x78] sm:$0xff]  }
   0x8   :  { %638 = vmatpush3.bf16.msra.mxu0 %v725_v6  ;;  %312 = vmatprep.subr.bf16.mxu1 %v785_v1  ;;  %v739_v21 = vld [vmem:[%s1005_s1 + $0xb0] sm:$0xff]   ;;  %v742_v28 = vld [vmem:[%s1005_s1 + $0xb8] sm:$0xff]   ;;  %v94_v29 = vcombine.high %v590_v23, %v590_v23  ;;  %v744_v33 = vld [vmem:[%s1005_s1 + $0xc0] sm:$0xff]   ;;  %v101_v36 = vrot.slane %v590_v23, %v100_v32 }
   0x9   :  { %639 = vmatprep.subr.bf16.mxu0 %v726_v7  ;;  %v740_v22 = vld [vmem:[%s1005_s1 + $0x30] sm:$0xff]   ;;  %v743_v31 = vld [vmem:[%s1005_s1 + $0x38] sm:$0xff]   ;;  %v745_v34 = vld [vmem:[%s1007_s3] sm:$0xff]  }
   0xa   :  { %v108_v35 = vrot.slane %v94_v29, %v100_v32  ;;  %v109_v39 = vcombine.high %v101_v36, %v101_v36  ;;  %v746_v40 = vld [vmem:[%s1007_s3 + $0x8] sm:$0xff]  }
   0xb   :  { %313 = vmatpush1.bf16.msra.mxu1 %v727_v8 }
   0xc   :  { %640 = vmatpush3.bf16.msra.mxu0 %v728_v9  ;;  %314 = vmatprep.subr.bf16.mxu1 %v785_v1  ;;  %v110_v37 = vcombine.high %v108_v35, %v108_v35 }
   0xd   :  { %641 = vmatprep.subr.bf16.mxu0 %v729_v10  ;;  %300 = vmatprep.mubr.bf16.mxu0 %v108_v35 }
   0xe   :  { %616 = vmatprep.mubr.msk.bf16.mxu1 %vm264_vm0, %v110_v37 }
   0xf   :  { %315 = vmatpush1.bf16.msra.mxu1 %v730_v11 }
  0x10   :  { %642 = vmatpush3.bf16.msra.mxu0 %v731_v12  ;;  %316 = vmatprep.subr.bf16.mxu1 %v785_v1 }
  0x11   :  { %643 = vmatprep.subr.bf16.mxu0 %v732_v13 }
  0x13   :  { %317 = vmatpush1.bf16.msra.mxu1 %v733_v14 }
  0x14   :  { %644 = vmatpush3.bf16.msra.mxu0 %v734_v15  ;;  %318 = vmatprep.subr.bf16.mxu1 %v785_v1 }
  0x15   :  { %645 = vmatprep.subr.bf16.mxu0 %v735_v16 }
  0x17   :  { %319 = vmatpush1.bf16.msra.mxu1 %v736_v17 }
  0x18   :  { %646 = vmatpush3.bf16.msra.mxu0 %v737_v18  ;;  %320 = vmatprep.subr.bf16.mxu1 %v785_v1 }
  0x19   :  { %647 = vmatprep.subr.bf16.mxu0 %v738_v19 }
  0x1b   :  { %321 = vmatpush1.bf16.msra.mxu1 %v739_v21 }
  0x1c   :  { %648 = vmatpush3.bf16.msra.mxu0 %v740_v22  ;;  %322 = vmatprep.subr.bf16.mxu1 %v785_v1 }
  0x1d   :  { %649 = vmatprep.subr.bf16.mxu0 %v741_v24 }
  0x1f   :  { %323 = vmatpush1.bf16.msra.mxu1 %v742_v28 }
  0x20   :  { %650 = vmatpush3.bf16.msra.mxu0 %v743_v31  ;;  %324 = vmatprep.subr.bf16.mxu1 %v785_v1 }
  0x21   :  { %675 = vmatprep.subr.bf16.mxu0 %v787_v38 }
  0x23   :  { %301 = vmatmul.mubr.bf16.vlgmr.msra.gmra.mrb[0].mxu0 %v101_v36  ;;  %325 = vmatpush1.bf16.msra.mxu1 %v744_v33 }
  0x24   :  { %676 = vmatpush3.bf16.msra.mxu0 %v745_v34  ;;  %695 = vmatprep.subr.bf16.mxu1 %v787_v38 }
  0x25   :  { %677 = vmatprep.subr.bf16.mxu0 %v787_v38 }
  0x26   :  { %341 = vmatmul.mubr.bf16.vlgmr.msra.gmra.mrb[0].mxu1 %v109_v39 }
  0x27   :  { %12 = vsyncpa [#allocation3], 0  ;;  %v747_v41 = vld [vmem:[%s1007_s3 + $0x10] sm:$0xff]   ;;  %v748_v42 = vld [vmem:[%s1007_s3 + $0x18] sm:$0xff]   ;;  %vm788_vm1 = vmmov 0   ;;  %s789_s16 = smov [#allocation2]  }
  0x28   :  { %678 = vmatpush3.bf16.msra.mxu0 %v746_v40  ;;  %v749_v43 = vld [vmem:[%s1007_s3 + $0x20] sm:$0xff]   ;;  %v750_v44 = vld [vmem:[%s1007_s3 + $0x28] sm:$0xff]   ;;  %v751_v45 = vld [vmem:[%s1007_s3 + $0x30] sm:$0xff]   ;;  %691 = vmatprep.mubr.msk.bf16.mxu0 %vm788_vm1, %v787_v38  ;;  %s581_s17 = sshll.u32 %s789_s16, 4  ;;  %s582_s17 = int_to_ptr.vmem [resolvable:$true] %s581_s17 }
  0x29   :  { %679 = vmatprep.subr.bf16.mxu0 %v787_v38  ;;  %v752_v46 = vld [vmem:[%s1007_s3 + $0x38] sm:$0xff]   ;;  %711 = vmatprep.mubr.msk.bf16.mxu1 %vm788_vm1, %v787_v38  ;;  %v753_v47 = vld [vmem:[%s1009_s5] sm:$0xff]   ;;  %v754_v48 = vld [vmem:[%s1009_s5 + $0x8] sm:$0xff]   ;;  %p766_p1 = scmp.lt.s32.totalorder %s582_s17, %s582_s17 }
  0x2a   :  { %696 = vmatpush3.bf16.msra.mxu1 %v753_v47  ;;  %v755_v49 = vld [vmem:[%s1009_s5 + $0x10] sm:$0xff]   ;;  %v756_v50 = vld [vmem:[%s1009_s5 + $0x18] sm:$0xff]   ;;  %v757_v51 = vld [vmem:[%s1009_s5 + $0x20] sm:$0xff]  }
  0x2b   :  { %697 = vmatprep.subr.bf16.mxu1 %v787_v38  ;;  %v758_v52 = vld [vmem:[%s1009_s5 + $0x28] sm:$0xff]   ;;  %v589_v55 = vld [vmem:[%s1006_s2] ss:$0 sm:$0xff]  ;;  %v759_v3 = vld [vmem:[%s1009_s5 + $0x30] sm:$0xff]  }
  0x2c   :  { %680 = vmatpush3.bf16.msra.mxu0 %v747_v41  ;;  %v760_v4 = vld [vmem:[%s1009_s5 + $0x38] sm:$0xff]   ;;  %v617_v5 = vld [vmem:[%s1008_s4] ss:$0 sm:$0xff]  ;;  %s761_s4 = scalar_lea.vmem %s582_s17, 32 }
  0x2d   :  { %681 = vmatprep.subr.bf16.mxu0 %v787_v38  ;;  %v626_v13 = vld [vmem:[%s1010_s6] ss:$0 sm:$0xff]  ;;  %p762_p0 = scmp.ne.s32.totalorder %s582_s17, %s761_s4  ;;  %p767_p2 = scmp.lt.s32.totalorder %s761_s4, %s761_s4 }
  0x2e   :  { %698 = vmatpush3.bf16.msra.mxu1 %v754_v48 }
  0x2f   :  { %699 = vmatprep.subr.bf16.mxu1 %v787_v38  ;;  %p768_p3 = por %p767_p2, %p766_p1 }
  0x30   :  { %682 = vmatpush3.bf16.msra.mxu0 %v748_v42 }
  0x31   :  { %683 = vmatprep.subr.bf16.mxu0 %v787_v38  ;;  %p769_p4 = pnand %p768_p3, %p762_p0 }
  0x32   :  { %700 = vmatpush3.bf16.msra.mxu1 %v755_v49 }
  0x33   :  { %701 = vmatprep.subr.bf16.mxu1 %v787_v38 }
  0x34   :  { %684 = vmatpush3.bf16.msra.mxu0 %v749_v43 }
  0x35   :  { %685 = vmatprep.subr.bf16.mxu0 %v787_v38 }
  0x36   :  { %702 = vmatpush3.bf16.msra.mxu1 %v756_v50 }
  0x37   :  { %703 = vmatprep.subr.bf16.mxu1 %v787_v38 }
  0x38   :  { %686 = vmatpush3.bf16.msra.mxu0 %v750_v44 }
  0x39   :  { %687 = vmatprep.subr.bf16.mxu0 %v787_v38 }
  0x3a   :  { %704 = vmatpush3.bf16.msra.mxu1 %v757_v51 }
  0x3b   :  { %705 = vmatprep.subr.bf16.mxu1 %v787_v38 }
  0x3c   :  { %688 = vmatpush3.bf16.msra.mxu0 %v751_v45 }
  0x3d   :  { %689 = vmatprep.subr.bf16.mxu0 %v787_v38 }
  0x3e   :  { %706 = vmatpush3.bf16.msra.mxu1 %v758_v52 }
  0x3f   :  { %707 = vmatprep.subr.bf16.mxu1 %v787_v38 }
  0x40   :  { %690 = vmatpush3.bf16.msra.mxu0 %v752_v46 }
  0x42   :  { %708 = vmatpush3.bf16.msra.mxu1 %v759_v3 }
  0x43   :  { %709 = vmatprep.subr.bf16.mxu1 %v787_v38 }
  0x46   :  { %710 = vmatpush3.bf16.msra.mxu1 %v760_v4 }
  0xf6   :  { %v651_v53 = vpop.f32.mrb[0].mxu0 }
  0xf7   :  { %v652_v54 = vpop.f32.mrb[1].mxu0 }
  0xf8   :  { %v653_v56 = vadd.f32 %v652_v54, %v651_v53  ;;  %v654_v57 = vpop.f32.mrb[2].mxu0 }
  0xf9   :  { %v655_v58 = vpop.f32.mrb[3].mxu0  ;;  %v342_v59 = vpop.f32.mrb[0].mxu1 }
  0xfa   :  { %v303_v60 = vadd.f32 %v653_v56, %v589_v55  ;;  %v344_v61 = vpop.f32.mrb[1].mxu1 }
  0xfb   :  { %v345_v62 = vpop.f32.mrb[2].mxu1 }
  0xfc   :  { %v343_v63 = vadd.f32 %v342_v59, %v303_v60  ;;  %v346_v0 = vpop.f32.mrb[3].mxu1 }
  0xfe   :  { %v348_v1 = vmax.f32 %v343_v63, 0.0 }
 0x100   :  { %v349_v2 = vpack.c.bf16 %v348_v1, %v348_v1 }
 0x102   :  { %692 = vmatmul.mubr.bf16.vlgmr.msra.gmra.mrb[4].mxu0 %v349_v2 }
 0x1d5   :  { %v455_v6 = vpop.f32.mrb[4].mxu0 }
 0x1d6   :  { %v456_v7 = vadd.f32 %v617_v5, %v455_v6  ;;  %v693_v8 = vpop.f32.mrb[5].mxu0 }
 0x1d7   :  { %v458_v9 = vpop.f32.mrb[6].mxu0 }
 0x1d8   :  { %v461_v10 = vmax.f32 %v456_v7, 0.0  ;;  %v694_v11 = vpop.f32.mrb[7].mxu0 }
 0x1da   :  { %v462_v12 = vpack.c.bf16 %v461_v10, %v461_v10 }
 0x1dc   :  { %712 = vmatmul.mubr.bf16.vlgmr.msra.gmra.mrb[4].mxu1 %v462_v12 }
 0x2af   :  { %v568_v14 = vpop.f32.mrb[4].mxu1 }
 0x2b0   :  { %v569_v15 = vadd.f32 %v626_v13, %v568_v14  ;;  %v713_v16 = vpop.f32.mrb[5].mxu1 }
 0x2b1   :  { %v571_v17 = vpop.f32.mrb[6].mxu1 }
 0x2b2   :  { %574 = vst [vmem:[#allocation2] sm:$0x3] %v569_v15  ;;  %v714_v18 = vpop.f32.mrb[7].mxu1 }
 0x2b3   :  { %772 = shalt.err (!%p769_p4)
}
 0x2b4   :  { %s773_s6 = scalar_lea.hbm %s1011_s7, 32 }
 0x2b5   :  { %p774_p5 = scmp.ne.s32.totalorder %s1011_s7, %s773_s6  ;;  %p777_p6 = scmp.lt.u32.totalorder %s773_s6, %s1011_s7 }
 0x2b7   :  { %p779_p7 = pnand %p777_p6, %p774_p5 }
 0x2b9   :  { %782 = shalt.err (!%p779_p7)
}
 0x2ba   :  { %584 = dma.vmem_to_hbm [thread:$0]  %s582_s17, 32, %s1011_s7, [#allocation3]  }
 0x2bb   :  { %783 = dma.done.wait [#allocation3], 32  }
 0x2bc   :  { %784 = vsyncadd [#allocation3], 4294967264 }
 0x2bd   :  { %588 = vsyncpa [#allocation3], 1 }

</bundles_post_ra>
